<compile_context>
chip_gen: v6e
topology: v6e:2x2x1
jax: 0.10.0
libtpu: 0.0.40
codegen_flags: <defaults>
</compile_context>

<pallas_src>
import functools

import jax
import jax.numpy as jnp
import numpy as np
from jax.experimental import pallas as pl
from jax.experimental.pallas import tpu as pltpu

EPS = 1e-5
SIGMOID_ALPHA = 0.1  # CustomSigmoid slope


# ----------------------------- in-kernel helpers -----------------------------

def _shift_stack(x):
    """Stack [x[t-1]; x[t]; x[t+1]] along channels with zero boundaries.

    x: (C, T) f32 -> (3C, T) f32. Shifts use pltpu.roll (XLU slot) + boundary mask,
    avoiding pad/concat copies along the lane axis."""
    c, t = x.shape
    t_idx = jax.lax.broadcasted_iota(jnp.int32, (c, t), 1)
    x_prev = jnp.where(t_idx == 0, 0.0, pltpu.roll(x, shift=1, axis=1))        # x[t-1]
    x_next = jnp.where(t_idx == t - 1, 0.0, pltpu.roll(x, shift=t - 1, axis=1))  # x[t+1]
    return jnp.concatenate([x_prev, x, x_next], axis=0)


def _conv1d_k3(x, w_stacked, b):
    """1-D conv, kernel=3, padding=1 (PyTorch semantics) as ONE MXU matmul.

    x: (C_in, T) f32, w_stacked: (C_out, 3*C_in) bf16 (columns = [k0|k1|k2]),
    b: (C_out, 1) f32 -> (C_out, T) f32."""
    x3 = _shift_stack(x).astype(w_stacked.dtype)
    return jnp.dot(w_stacked, x3, preferred_element_type=jnp.float32) + b


def _stats(x):
    """Per-channel mean / std over time. x: (C, T) -> ((C,1), (C,1)) in f32."""
    mean = jnp.mean(x, axis=1, keepdims=True)
    var = jnp.mean(jnp.square(x - mean), axis=1, keepdims=True)
    return mean, jnp.sqrt(var + EPS)


def _inorm(x):
    mean, std = _stats(x)
    return (x - mean) / std, mean, std


# ------------------------------- fused kernel --------------------------------

def _fused_kernel(roll_shift, *refs):
    """Full AgainVC forward for one batch element, entirely resident in VMEM.

    roll_shift: static int  -> derive target = roll(source, T//2) in-kernel (target=None path)
                None        -> an explicit target block is the 2nd input ref.
    """
    if roll_shift is None:
        (src_ref, tgt_ref, bias_h_ref,
         ew_in_ref, ew_cv_ref, ew_out_ref, eb_out_ref,
         dw_in_ref, dw_cv_ref, dw_out_ref, db_out_ref,
         out_ref) = refs
    else:
        (src_ref, bias_h_ref,
         ew_in_ref, ew_cv_ref, ew_out_ref, eb_out_ref,
         dw_in_ref, dw_cv_ref, dw_out_ref, db_out_ref,
         out_ref) = refs

    src = src_ref[0]                                   # (melbins, T) f32
    if roll_shift is None:
        tgt = tgt_ref[0]
    else:
        # target = cat(src[:, T//2:], src[:, :T//2])  ==  roll along time by (T - T//2)
        tgt = pltpu.roll(src, shift=roll_shift, axis=1)

    b_h = bias_h_ref[...]                              # (c_h, 4) packed conv biases
    b_enc_in, b_enc_cv = b_h[:, 0:1], b_h[:, 1:2]
    b_dec_in, b_dec_cv = b_h[:, 2:3], b_h[:, 3:4]
    ew_in, ew_cv, ew_out = ew_in_ref[...], ew_cv_ref[...], ew_out_ref[...]
    dw_in, dw_cv, dw_out = dw_in_ref[...], dw_cv_ref[...], dw_out_ref[...]

    def enc_trunk(x):
        y = jax.nn.relu(_conv1d_k3(x, ew_in, b_enc_in))
        return y + jax.nn.relu(_conv1d_k3(y, ew_cv, b_enc_cv))      # residual block

    # ---- encoder(source): content path ----
    y_s = enc_trunk(src)
    y_s_n, _, _ = _inorm(y_s)
    content = (jnp.dot(ew_out, y_s_n.astype(ew_out.dtype),
                       preferred_element_type=jnp.float32) + eb_out_ref[...])   # (c_lat, T)
    # CustomSigmoid fused into the encoder epilogue (exp runs on the EUP slot).
    content = 1.0 / (1.0 + jnp.exp(-SIGMOID_ALPHA * content))

    # ---- encoder(target): style path. Only mean/std are consumed by the decoder,
    #      so its content projection + sigmoid (dead work in the reference) are skipped.
    y_t = enc_trunk(tgt)
    tgt_mean, tgt_std = _stats(y_t)

    # ---- decoder ----
    z = jax.nn.relu(_conv1d_k3(content, dw_in, b_dec_in))           # (c_h, T)
    z_n, _, _ = _inorm(z)
    z = z_n * tgt_std + tgt_mean                                    # AdaIN with target style
    z = z + jax.nn.relu(_conv1d_k3(z, dw_cv, b_dec_cv))             # residual block
    out = (jnp.dot(dw_out, z.astype(dw_out.dtype),
                   preferred_element_type=jnp.float32) + db_out_ref[...])       # (melbins, T)
    out_ref[0] = out.astype(out_ref.dtype)


# --------------------------------- wrapper ------------------------------------

def again_vc_forward(source, target, params):
    """Mirrors AgainVC.forward. source/target: (B, melbins, seglen).

    The full forward is ONE pallas_call; grid=(B,) is 'parallel' so v7x can split the
    batch over its two TensorCores while v5e/v6e run it as a 2-step pipeline."""
    B, melbins, T = source.shape
    c_h = params["enc_w_in"].shape[0]
    c_lat = params["enc_w_out"].shape[0]

    xmap = lambda b: (b, 0, 0)
    wmap = lambda b: (0, 0)

    inputs = [source]
    in_specs = [pl.BlockSpec((1, melbins, T), xmap)]
    if target is None:
        # target[t] = source[(t + T//2) % T]  ==  jnp.roll(source, T - T//2) along time
        roll_shift = (T - T // 2) % max(T, 1)
    else:
        roll_shift = None
        inputs.append(target)
        in_specs.append(pl.BlockSpec((1, melbins, T), xmap))

    inputs += [params["bias_h"],
               params["enc_w_in"], params["enc_w_cv"],
               params["enc_w_out"], params["enc_b_out"],
               params["dec_w_in"], params["dec_w_cv"],
               params["dec_w_out"], params["dec_b_out"]]
    in_specs += [pl.BlockSpec((c_h, 4), wmap),
                 pl.BlockSpec((c_h, 3 * melbins), wmap),
                 pl.BlockSpec((c_h, 3 * c_h), wmap),
                 pl.BlockSpec((c_lat, c_h), wmap),
                 pl.BlockSpec((c_lat, 1), wmap),
                 pl.BlockSpec((c_h, 3 * c_lat), wmap),
                 pl.BlockSpec((c_h, 3 * c_h), wmap),
                 pl.BlockSpec((melbins, c_h), wmap),
                 pl.BlockSpec((melbins, 1), wmap)]

    return pl.pallas_call(
        functools.partial(_fused_kernel, roll_shift),
        out_shape=jax.ShapeDtypeStruct((B, melbins, T), jnp.float32),
        grid=(B,),
        in_specs=in_specs,
        out_specs=pl.BlockSpec((1, melbins, T), xmap),
        compiler_params=pltpu.CompilerParams(dimension_semantics=("parallel",)),
    )(*inputs)


# ------------------------------ parameter init --------------------------------

def init_params(key, melbins, c_h, c_lat, mxu_dtype=jnp.bfloat16):
    """Weights are stored pre-packed for the kernel:
      * k=3 conv weights (PyTorch layout (C_out, C_in, 3)) are reshaped ONCE to a stacked
        (C_out, 3*C_in) matrix (column blocks [k=0 | k=1 | k=2]) so each conv is one matmul
        against [x[t-1]; x[t]; x[t+1]].
      * MXU operands are bf16 (f32 accumulation in-kernel); biases / element-wise stay f32.
      * the four per-channel conv biases are packed into one (c_h, 4) tensor to cut
        tiny-DMA descriptor count."""
    def conv_w(k, c_out, c_in):
        w = jax.random.normal(k, (c_out, c_in, 3), jnp.float32) / jnp.sqrt(3.0 * c_in)
        return jnp.transpose(w, (0, 2, 1)).reshape(c_out, 3 * c_in).astype(mxu_dtype)

    def proj_w(k, c_out, c_in):
        w = jax.random.normal(k, (c_out, c_in), jnp.float32) / jnp.sqrt(float(c_in))
        return w.astype(mxu_dtype)

    ks = jax.random.split(key, 7)
    return {
        "enc_w_in":  conv_w(ks[0], c_h, melbins),
        "enc_w_cv":  conv_w(ks[1], c_h, c_h),
        "enc_w_out": proj_w(ks[2], c_lat, c_h),
        "enc_b_out": jnp.zeros((c_lat, 1), jnp.float32),
        "dec_w_in":  conv_w(ks[3], c_h, c_lat),
        "dec_w_cv":  conv_w(ks[4], c_h, c_h),
        "dec_w_out": proj_w(ks[5], melbins, c_h),
        "dec_b_out": jnp.zeros((melbins, 1), jnp.float32),
        # packed per-channel conv biases, columns = [enc_in, enc_cv, dec_in, dec_cv]
        "bias_h":    0.01 * jax.random.normal(ks[6], (c_h, 4), jnp.float32),
    }


# ------------------------- pure-JAX reference (check) --------------------------

def _reference_forward(source, target, p):
    """Pure-JAX/XLA reference with the same numerics (bf16 matmul inputs, f32 accum)."""
    def conv3(x, w, b):
        B, C, T = x.shape
        xp = jnp.pad(x, ((0, 0), (0, 0), (1, 1)))
        x3 = jnp.concatenate([xp[:, :, :T], xp[:, :, 1:T + 1], xp[:, :, 2:]], axis=1)
        y = jnp.einsum("oc,bct->bot", w, x3.astype(w.dtype),
                       preferred_element_type=jnp.float32)
        return y + b[None]

    def stats(x):
        mean = jnp.mean(x, axis=2, keepdims=True)
        var = jnp.mean(jnp.square(x - mean), axis=2, keepdims=True)
        return mean, jnp.sqrt(var + EPS)

    def encode(x):
        y = jax.nn.relu(conv3(x, p["enc_w_in"], p["bias_h"][:, 0:1]))
        y = y + jax.nn.relu(conv3(y, p["enc_w_cv"], p["bias_h"][:, 1:2]))
        mean, std = stats(y)
        y_n = (y - mean) / std
        content = jnp.einsum("oc,bct->bot", p["enc_w_out"],
                             y_n.astype(p["enc_w_out"].dtype),
                             preferred_element_type=jnp.float32) + p["enc_b_out"][None]
        return content, mean, std

    if target is None:
        T = source.shape[2]
        target = jnp.concatenate([source[:, :, T // 2:], source[:, :, :T // 2]], axis=2)

    s_content, _, _ = encode(source)
    _t_content, t_mean, t_std = encode(target)   # target content is dead in the decoder
    s_content = 1.0 / (1.0 + jnp.exp(-SIGMOID_ALPHA * s_content))
    z = jax.nn.relu(conv3(s_content, p["dec_w_in"], p["bias_h"][:, 2:3]))
    mean, std = stats(z)
    z = (z - mean) / std * t_std + t_mean
    z = z + jax.nn.relu(conv3(z, p["dec_w_cv"], p["bias_h"][:, 3:4]))
    return jnp.einsum("oc,bct->bot", p["dec_w_out"], z.astype(p["dec_w_out"].dtype),
                      preferred_element_type=jnp.float32) + p["dec_b_out"][None]


# ----------------------------------- main --------------------------------------

if __name__ == "__main__":
    B, MELBINS, SEGLEN = 2, 80, 128     # seglen 128 -> lane-dense vregs / unmasked stores
    C_H, C_LAT = 64, 8                  # c_lat chosen sublane-aligned (multiple of 8)

    key = jax.random.PRNGKey(0)
    params = init_params(key, MELBINS, C_H, C_LAT)
    source = jax.random.normal(jax.random.fold_in(key, 123),
                               (B, MELBINS, SEGLEN), dtype=jnp.float32)

    # target=None path (target is the half-rolled source), exactly as in forward()
    out = again_vc_forward(source, None, params)
    out = jax.block_until_ready(out)

    assert out.shape == (B, MELBINS, SEGLEN), out.shape
    assert out.dtype == jnp.float32
    assert bool(jnp.all(jnp.isfinite(out)))

    ref = jax.block_until_ready(_reference_forward(source, None, params))
    np.testing.assert_allclose(np.asarray(out), np.asarray(ref), atol=5e-2, rtol=5e-2)

    # TODO(synk): Encoder/Decoder/CustomSigmoid bodies are not in the reference snippet;
    # they are reconstructed AGAIN-VC style (conv k=3 residual blocks + InstanceNorm/AdaIN,
    # sigmoid slope 0.1), consistent with the previous submission.
    print("KERNEL_OK")
</pallas_src>

<mosaic_0001>
module attributes {stable_mosaic.version = 11 : i64} {
  func.func @_fused_kernel(%arg0: i32, %arg1: memref<1x80x128xf32, #tpu.memory_space<vmem>>, %arg2: memref<64x4xf32, #tpu.memory_space<vmem>>, %arg3: memref<64x240xbf16, #tpu.memory_space<vmem>>, %arg4: memref<64x192xbf16, #tpu.memory_space<vmem>>, %arg5: memref<8x64xbf16, #tpu.memory_space<vmem>>, %arg6: memref<8x1xf32, #tpu.memory_space<vmem>>, %arg7: memref<64x24xbf16, #tpu.memory_space<vmem>>, %arg8: memref<64x192xbf16, #tpu.memory_space<vmem>>, %arg9: memref<80x64xbf16, #tpu.memory_space<vmem>>, %arg10: memref<80x1xf32, #tpu.memory_space<vmem>>, %arg11: memref<1x80x128xf32, #tpu.memory_space<vmem>>) attributes {dimension_semantics = [#tpu.dimension_semantics<parallel>], iteration_bounds = array<i64: 2>, scalar_prefetch = 0 : i64, scratch_operands = 0 : i64, tpu.core_type = #tpu.core_type<tc>, window_params = [{transform_indices = @transform_0, window_bounds = array<i64: 1, 80, 128>}, {pipeline_mode = #tpu.pipeline_mode<synchronous>, transform_indices = @transform_1, window_bounds = array<i64: 64, 4>}, {pipeline_mode = #tpu.pipeline_mode<synchronous>, transform_indices = @transform_2, window_bounds = array<i64: 64, 240>}, {pipeline_mode = #tpu.pipeline_mode<synchronous>, transform_indices = @transform_3, window_bounds = array<i64: 64, 192>}, {pipeline_mode = #tpu.pipeline_mode<synchronous>, transform_indices = @transform_4, window_bounds = array<i64: 8, 64>}, {pipeline_mode = #tpu.pipeline_mode<synchronous>, transform_indices = @transform_5, window_bounds = array<i64: 8, 1>}, {pipeline_mode = #tpu.pipeline_mode<synchronous>, transform_indices = @transform_6, window_bounds = array<i64: 64, 24>}, {pipeline_mode = #tpu.pipeline_mode<synchronous>, transform_indices = @transform_7, window_bounds = array<i64: 64, 192>}, {pipeline_mode = #tpu.pipeline_mode<synchronous>, transform_indices = @transform_8, window_bounds = array<i64: 80, 64>}, {pipeline_mode = #tpu.pipeline_mode<synchronous>, transform_indices = @transform_9, window_bounds = array<i64: 80, 1>}, {transform_indices = @transform_10, window_bounds = array<i64: 1, 80, 128>}]} {
    %c0 = arith.constant 0 : index
    %c0_0 = arith.constant 0 : index
    %c0_1 = arith.constant 0 : index
    %0 = vector.load %arg1[%c0, %c0_0, %c0_1] : memref<1x80x128xf32, #tpu.memory_space<vmem>>, vector<1x80x128xf32>
    %1 = vector.shape_cast %0 : vector<1x80x128xf32> to vector<80x128xf32>
    %c64_i32 = arith.constant 64 : i32
    %2 = tpu.dynamic_rotate %1 by %c64_i32 dim 1 : vector<80x128xf32>, i32 -> vector<80x128xf32>
    %c0_2 = arith.constant 0 : index
    %c0_3 = arith.constant 0 : index
    %3 = vector.load %arg2[%c0_2, %c0_3] : memref<64x4xf32, #tpu.memory_space<vmem>>, vector<64x4xf32>
    %4 = vector.extract_strided_slice %3 {offsets = [0, 0], sizes = [64, 1], strides = [1, 1]} : vector<64x4xf32> to vector<64x1xf32>
    %5 = vector.extract_strided_slice %3 {offsets = [0, 1], sizes = [64, 1], strides = [1, 1]} : vector<64x4xf32> to vector<64x1xf32>
    %6 = vector.extract_strided_slice %3 {offsets = [0, 2], sizes = [64, 1], strides = [1, 1]} : vector<64x4xf32> to vector<64x1xf32>
    %7 = vector.extract_strided_slice %3 {offsets = [0, 3], sizes = [64, 1], strides = [1, 1]} : vector<64x4xf32> to vector<64x1xf32>
    %c0_4 = arith.constant 0 : index
    %c0_5 = arith.constant 0 : index
    %8 = vector.load %arg3[%c0_4, %c0_5] : memref<64x240xbf16, #tpu.memory_space<vmem>>, vector<64x240xbf16>
    %c0_6 = arith.constant 0 : index
    %c0_7 = arith.constant 0 : index
    %9 = vector.load %arg4[%c0_6, %c0_7] : memref<64x192xbf16, #tpu.memory_space<vmem>>, vector<64x192xbf16>
    %c0_8 = arith.constant 0 : index
    %c0_9 = arith.constant 0 : index
    %10 = vector.load %arg5[%c0_8, %c0_9] : memref<8x64xbf16, #tpu.memory_space<vmem>>, vector<8x64xbf16>
    %c0_10 = arith.constant 0 : index
    %c0_11 = arith.constant 0 : index
    %11 = vector.load %arg7[%c0_10, %c0_11] : memref<64x24xbf16, #tpu.memory_space<vmem>>, vector<64x24xbf16>
    %c0_12 = arith.constant 0 : index
    %c0_13 = arith.constant 0 : index
    %12 = vector.load %arg8[%c0_12, %c0_13] : memref<64x192xbf16, #tpu.memory_space<vmem>>, vector<64x192xbf16>
    %c0_14 = arith.constant 0 : index
    %c0_15 = arith.constant 0 : index
    %13 = vector.load %arg9[%c0_14, %c0_15] : memref<80x64xbf16, #tpu.memory_space<vmem>>, vector<80x64xbf16>
    %14 = tpu.iota {dimensions = array<i32: 1>} : vector<80x128xi32>
    %c0_i32 = arith.constant 0 : i32
    %15 = vector.broadcast %c0_i32 : i32 to vector<80x128xi32>
    %16 = arith.cmpi eq, %14, %15 : vector<80x128xi32>
    %c1_i32 = arith.constant 1 : i32
    %17 = tpu.dynamic_rotate %1 by %c1_i32 dim 1 : vector<80x128xf32>, i32 -> vector<80x128xf32>
    %cst = arith.constant 0.000000e+00 : f32
    %18 = vector.broadcast %cst : f32 to vector<80x128xf32>
    %19 = arith.select %16, %18, %17 : vector<80x128xi1>, vector<80x128xf32>
    %c127_i32 = arith.constant 127 : i32
    %20 = vector.broadcast %c127_i32 : i32 to vector<80x128xi32>
    %21 = arith.cmpi eq, %14, %20 : vector<80x128xi32>
    %c127_i32_16 = arith.constant 127 : i32
    %22 = tpu.dynamic_rotate %1 by %c127_i32_16 dim 1 : vector<80x128xf32>, i32 -> vector<80x128xf32>
    %cst_17 = arith.constant 0.000000e+00 : f32
    %23 = vector.broadcast %cst_17 : f32 to vector<80x128xf32>
    %24 = arith.select %21, %23, %22 : vector<80x128xi1>, vector<80x128xf32>
    %25 = tpu.concatenate %19, %1, %24 in 0 : vector<80x128xf32>, vector<80x128xf32>, vector<80x128xf32> -> vector<240x128xf32>
    %26 = arith.truncf %25 : vector<240x128xf32> to vector<240x128xbf16>
    %cst_18 = arith.constant dense<0.000000e+00> : vector<64x128xf32>
    %27 = tpu.matmul %8, %26, %cst_18 {dimension_numbers = #tpu.dot_dimension_numbers<[1], [0], [0], [1], [0, 0, 1, 1], [], []>} : vector<64x240xbf16>, vector<240x128xbf16>, vector<64x128xf32> -> vector<64x128xf32>
    %28 = vector.broadcast %4 : vector<64x1xf32> to vector<64x128xf32>
    %29 = arith.addf %27, %28 : vector<64x128xf32>
    %cst_19 = arith.constant 0.000000e+00 : f32
    %30 = vector.broadcast %cst_19 : f32 to vector<64x128xf32>
    %31 = arith.maximumf %29, %30 : vector<64x128xf32>
    %32 = tpu.iota {dimensions = array<i32: 1>} : vector<64x128xi32>
    %c0_i32_20 = arith.constant 0 : i32
    %33 = vector.broadcast %c0_i32_20 : i32 to vector<64x128xi32>
    %34 = arith.cmpi eq, %32, %33 : vector<64x128xi32>
    %c1_i32_21 = arith.constant 1 : i32
    %35 = tpu.dynamic_rotate %31 by %c1_i32_21 dim 1 : vector<64x128xf32>, i32 -> vector<64x128xf32>
    %cst_22 = arith.constant 0.000000e+00 : f32
    %36 = vector.broadcast %cst_22 : f32 to vector<64x128xf32>
    %37 = arith.select %34, %36, %35 : vector<64x128xi1>, vector<64x128xf32>
    %c127_i32_23 = arith.constant 127 : i32
    %38 = vector.broadcast %c127_i32_23 : i32 to vector<64x128xi32>
    %39 = arith.cmpi eq, %32, %38 : vector<64x128xi32>
    %c127_i32_24 = arith.constant 127 : i32
    %40 = tpu.dynamic_rotate %31 by %c127_i32_24 dim 1 : vector<64x128xf32>, i32 -> vector<64x128xf32>
    %cst_25 = arith.constant 0.000000e+00 : f32
    %41 = vector.broadcast %cst_25 : f32 to vector<64x128xf32>
    %42 = arith.select %39, %41, %40 : vector<64x128xi1>, vector<64x128xf32>
    %43 = tpu.concatenate %37, %31, %42 in 0 : vector<64x128xf32>, vector<64x128xf32>, vector<64x128xf32> -> vector<192x128xf32>
    %44 = arith.truncf %43 : vector<192x128xf32> to vector<192x128xbf16>
    %cst_26 = arith.constant dense<0.000000e+00> : vector<64x128xf32>
    %45 = tpu.matmul %9, %44, %cst_26 {dimension_numbers = #tpu.dot_dimension_numbers<[1], [0], [0], [1], [0, 0, 1, 1], [], []>} : vector<64x192xbf16>, vector<192x128xbf16>, vector<64x128xf32> -> vector<64x128xf32>
    %46 = vector.broadcast %5 : vector<64x1xf32> to vector<64x128xf32>
    %47 = arith.addf %45, %46 : vector<64x128xf32>
    %cst_27 = arith.constant 0.000000e+00 : f32
    %48 = vector.broadcast %cst_27 : f32 to vector<64x128xf32>
    %49 = arith.maximumf %47, %48 : vector<64x128xf32>
    %50 = arith.addf %31, %49 : vector<64x128xf32>
    %cst_28 = arith.constant dense<0.000000e+00> : vector<64xf32>
    %51 = vector.multi_reduction <add>, %50, %cst_28 [1] : vector<64x128xf32> to vector<64xf32>
    %52 = vector.shape_cast %51 : vector<64xf32> to vector<64x1xf32>
    %cst_29 = arith.constant 1.280000e+02 : f32
    %53 = vector.broadcast %cst_29 : f32 to vector<64x1xf32>
    %54 = arith.divf %52, %53 : vector<64x1xf32>
    %55 = vector.broadcast %54 : vector<64x1xf32> to vector<64x128xf32>
    %56 = arith.subf %50, %55 : vector<64x128xf32>
    %57 = arith.mulf %56, %56 : vector<64x128xf32>
    %cst_30 = arith.constant dense<0.000000e+00> : vector<64xf32>
    %58 = vector.multi_reduction <add>, %57, %cst_30 [1] : vector<64x128xf32> to vector<64xf32>
    %59 = vector.shape_cast %58 : vector<64xf32> to vector<64x1xf32>
    %cst_31 = arith.constant 1.280000e+02 : f32
    %60 = vector.broadcast %cst_31 : f32 to vector<64x1xf32>
    %61 = arith.divf %59, %60 : vector<64x1xf32>
    %cst_32 = arith.constant 9.99999974E-6 : f32
    %62 = vector.broadcast %cst_32 : f32 to vector<64x1xf32>
    %63 = arith.addf %61, %62 : vector<64x1xf32>
    %64 = math.sqrt %63 : vector<64x1xf32>
    %65 = vector.broadcast %54 : vector<64x1xf32> to vector<64x128xf32>
    %66 = arith.subf %50, %65 : vector<64x128xf32>
    %67 = vector.broadcast %64 : vector<64x1xf32> to vector<64x128xf32>
    %68 = arith.divf %66, %67 : vector<64x128xf32>
    %69 = arith.truncf %68 : vector<64x128xf32> to vector<64x128xbf16>
    %cst_33 = arith.constant dense<0.000000e+00> : vector<8x128xf32>
    %70 = tpu.matmul %10, %69, %cst_33 {dimension_numbers = #tpu.dot_dimension_numbers<[1], [0], [0], [1], [0, 0, 1, 1], [], []>} : vector<8x64xbf16>, vector<64x128xbf16>, vector<8x128xf32> -> vector<8x128xf32>
    %c0_34 = arith.constant 0 : index
    %c0_35 = arith.constant 0 : index
    %71 = vector.load %arg6[%c0_34, %c0_35] : memref<8x1xf32, #tpu.memory_space<vmem>>, vector<8x1xf32>
    %72 = vector.broadcast %71 : vector<8x1xf32> to vector<8x128xf32>
    %73 = arith.addf %70, %72 : vector<8x128xf32>
    %cst_36 = arith.constant -1.000000e-01 : f32
    %74 = vector.broadcast %cst_36 : f32 to vector<8x128xf32>
    %75 = arith.mulf %74, %73 : vector<8x128xf32>
    %76 = math.exp %75 : vector<8x128xf32>
    %cst_37 = arith.constant 1.000000e+00 : f32
    %77 = vector.broadcast %cst_37 : f32 to vector<8x128xf32>
    %78 = arith.addf %77, %76 : vector<8x128xf32>
    %cst_38 = arith.constant 1.000000e+00 : f32
    %79 = vector.broadcast %cst_38 : f32 to vector<8x128xf32>
    %80 = arith.divf %79, %78 : vector<8x128xf32>
    %81 = tpu.iota {dimensions = array<i32: 1>} : vector<80x128xi32>
    %c0_i32_39 = arith.constant 0 : i32
    %82 = vector.broadcast %c0_i32_39 : i32 to vector<80x128xi32>
    %83 = arith.cmpi eq, %81, %82 : vector<80x128xi32>
    %c1_i32_40 = arith.constant 1 : i32
    %84 = tpu.dynamic_rotate %2 by %c1_i32_40 dim 1 : vector<80x128xf32>, i32 -> vector<80x128xf32>
    %cst_41 = arith.constant 0.000000e+00 : f32
    %85 = vector.broadcast %cst_41 : f32 to vector<80x128xf32>
    %86 = arith.select %83, %85, %84 : vector<80x128xi1>, vector<80x128xf32>
    %c127_i32_42 = arith.constant 127 : i32
    %87 = vector.broadcast %c127_i32_42 : i32 to vector<80x128xi32>
    %88 = arith.cmpi eq, %81, %87 : vector<80x128xi32>
    %c127_i32_43 = arith.constant 127 : i32
    %89 = tpu.dynamic_rotate %2 by %c127_i32_43 dim 1 : vector<80x128xf32>, i32 -> vector<80x128xf32>
    %cst_44 = arith.constant 0.000000e+00 : f32
    %90 = vector.broadcast %cst_44 : f32 to vector<80x128xf32>
    %91 = arith.select %88, %90, %89 : vector<80x128xi1>, vector<80x128xf32>
    %92 = tpu.concatenate %86, %2, %91 in 0 : vector<80x128xf32>, vector<80x128xf32>, vector<80x128xf32> -> vector<240x128xf32>
    %93 = arith.truncf %92 : vector<240x128xf32> to vector<240x128xbf16>
    %cst_45 = arith.constant dense<0.000000e+00> : vector<64x128xf32>
    %94 = tpu.matmul %8, %93, %cst_45 {dimension_numbers = #tpu.dot_dimension_numbers<[1], [0], [0], [1], [0, 0, 1, 1], [], []>} : vector<64x240xbf16>, vector<240x128xbf16>, vector<64x128xf32> -> vector<64x128xf32>
    %95 = vector.broadcast %4 : vector<64x1xf32> to vector<64x128xf32>
    %96 = arith.addf %94, %95 : vector<64x128xf32>
    %cst_46 = arith.constant 0.000000e+00 : f32
    %97 = vector.broadcast %cst_46 : f32 to vector<64x128xf32>
    %98 = arith.maximumf %96, %97 : vector<64x128xf32>
    %99 = tpu.iota {dimensions = array<i32: 1>} : vector<64x128xi32>
    %c0_i32_47 = arith.constant 0 : i32
    %100 = vector.broadcast %c0_i32_47 : i32 to vector<64x128xi32>
    %101 = arith.cmpi eq, %99, %100 : vector<64x128xi32>
    %c1_i32_48 = arith.constant 1 : i32
    %102 = tpu.dynamic_rotate %98 by %c1_i32_48 dim 1 : vector<64x128xf32>, i32 -> vector<64x128xf32>
    %cst_49 = arith.constant 0.000000e+00 : f32
    %103 = vector.broadcast %cst_49 : f32 to vector<64x128xf32>
    %104 = arith.select %101, %103, %102 : vector<64x128xi1>, vector<64x128xf32>
    %c127_i32_50 = arith.constant 127 : i32
    %105 = vector.broadcast %c127_i32_50 : i32 to vector<64x128xi32>
    %106 = arith.cmpi eq, %99, %105 : vector<64x128xi32>
    %c127_i32_51 = arith.constant 127 : i32
    %107 = tpu.dynamic_rotate %98 by %c127_i32_51 dim 1 : vector<64x128xf32>, i32 -> vector<64x128xf32>
    %cst_52 = arith.constant 0.000000e+00 : f32
    %108 = vector.broadcast %cst_52 : f32 to vector<64x128xf32>
    %109 = arith.select %106, %108, %107 : vector<64x128xi1>, vector<64x128xf32>
    %110 = tpu.concatenate %104, %98, %109 in 0 : vector<64x128xf32>, vector<64x128xf32>, vector<64x128xf32> -> vector<192x128xf32>
    %111 = arith.truncf %110 : vector<192x128xf32> to vector<192x128xbf16>
    %cst_53 = arith.constant dense<0.000000e+00> : vector<64x128xf32>
    %112 = tpu.matmul %9, %111, %cst_53 {dimension_numbers = #tpu.dot_dimension_numbers<[1], [0], [0], [1], [0, 0, 1, 1], [], []>} : vector<64x192xbf16>, vector<192x128xbf16>, vector<64x128xf32> -> vector<64x128xf32>
    %113 = vector.broadcast %5 : vector<64x1xf32> to vector<64x128xf32>
    %114 = arith.addf %112, %113 : vector<64x128xf32>
    %cst_54 = arith.constant 0.000000e+00 : f32
    %115 = vector.broadcast %cst_54 : f32 to vector<64x128xf32>
    %116 = arith.maximumf %114, %115 : vector<64x128xf32>
    %117 = arith.addf %98, %116 : vector<64x128xf32>
    %cst_55 = arith.constant dense<0.000000e+00> : vector<64xf32>
    %118 = vector.multi_reduction <add>, %117, %cst_55 [1] : vector<64x128xf32> to vector<64xf32>
    %119 = vector.shape_cast %118 : vector<64xf32> to vector<64x1xf32>
    %cst_56 = arith.constant 1.280000e+02 : f32
    %120 = vector.broadcast %cst_56 : f32 to vector<64x1xf32>
    %121 = arith.divf %119, %120 : vector<64x1xf32>
    %122 = vector.broadcast %121 : vector<64x1xf32> to vector<64x128xf32>
    %123 = arith.subf %117, %122 : vector<64x128xf32>
    %124 = arith.mulf %123, %123 : vector<64x128xf32>
    %cst_57 = arith.constant dense<0.000000e+00> : vector<64xf32>
    %125 = vector.multi_reduction <add>, %124, %cst_57 [1] : vector<64x128xf32> to vector<64xf32>
    %126 = vector.shape_cast %125 : vector<64xf32> to vector<64x1xf32>
    %cst_58 = arith.constant 1.280000e+02 : f32
    %127 = vector.broadcast %cst_58 : f32 to vector<64x1xf32>
    %128 = arith.divf %126, %127 : vector<64x1xf32>
    %cst_59 = arith.constant 9.99999974E-6 : f32
    %129 = vector.broadcast %cst_59 : f32 to vector<64x1xf32>
    %130 = arith.addf %128, %129 : vector<64x1xf32>
    %131 = math.sqrt %130 : vector<64x1xf32>
    %132 = tpu.iota {dimensions = array<i32: 1>} : vector<8x128xi32>
    %c0_i32_60 = arith.constant 0 : i32
    %133 = vector.broadcast %c0_i32_60 : i32 to vector<8x128xi32>
    %134 = arith.cmpi eq, %132, %133 : vector<8x128xi32>
    %c1_i32_61 = arith.constant 1 : i32
    %135 = tpu.dynamic_rotate %80 by %c1_i32_61 dim 1 : vector<8x128xf32>, i32 -> vector<8x128xf32>
    %cst_62 = arith.constant 0.000000e+00 : f32
    %136 = vector.broadcast %cst_62 : f32 to vector<8x128xf32>
    %137 = arith.select %134, %136, %135 : vector<8x128xi1>, vector<8x128xf32>
    %c127_i32_63 = arith.constant 127 : i32
    %138 = vector.broadcast %c127_i32_63 : i32 to vector<8x128xi32>
    %139 = arith.cmpi eq, %132, %138 : vector<8x128xi32>
    %c127_i32_64 = arith.constant 127 : i32
    %140 = tpu.dynamic_rotate %80 by %c127_i32_64 dim 1 : vector<8x128xf32>, i32 -> vector<8x128xf32>
    %cst_65 = arith.constant 0.000000e+00 : f32
    %141 = vector.broadcast %cst_65 : f32 to vector<8x128xf32>
    %142 = arith.select %139, %141, %140 : vector<8x128xi1>, vector<8x128xf32>
    %143 = tpu.concatenate %137, %80, %142 in 0 : vector<8x128xf32>, vector<8x128xf32>, vector<8x128xf32> -> vector<24x128xf32>
    %144 = arith.truncf %143 : vector<24x128xf32> to vector<24x128xbf16>
    %cst_66 = arith.constant dense<0.000000e+00> : vector<64x128xf32>
    %145 = tpu.matmul %11, %144, %cst_66 {dimension_numbers = #tpu.dot_dimension_numbers<[1], [0], [0], [1], [0, 0, 1, 1], [], []>} : vector<64x24xbf16>, vector<24x128xbf16>, vector<64x128xf32> -> vector<64x128xf32>
    %146 = vector.broadcast %6 : vector<64x1xf32> to vector<64x128xf32>
    %147 = arith.addf %145, %146 : vector<64x128xf32>
    %cst_67 = arith.constant 0.000000e+00 : f32
    %148 = vector.broadcast %cst_67 : f32 to vector<64x128xf32>
    %149 = arith.maximumf %147, %148 : vector<64x128xf32>
    %cst_68 = arith.constant dense<0.000000e+00> : vector<64xf32>
    %150 = vector.multi_reduction <add>, %149, %cst_68 [1] : vector<64x128xf32> to vector<64xf32>
    %151 = vector.shape_cast %150 : vector<64xf32> to vector<64x1xf32>
    %cst_69 = arith.constant 1.280000e+02 : f32
    %152 = vector.broadcast %cst_69 : f32 to vector<64x1xf32>
    %153 = arith.divf %151, %152 : vector<64x1xf32>
    %154 = vector.broadcast %153 : vector<64x1xf32> to vector<64x128xf32>
    %155 = arith.subf %149, %154 : vector<64x128xf32>
    %156 = arith.mulf %155, %155 : vector<64x128xf32>
    %cst_70 = arith.constant dense<0.000000e+00> : vector<64xf32>
    %157 = vector.multi_reduction <add>, %156, %cst_70 [1] : vector<64x128xf32> to vector<64xf32>
    %158 = vector.shape_cast %157 : vector<64xf32> to vector<64x1xf32>
    %cst_71 = arith.constant 1.280000e+02 : f32
    %159 = vector.broadcast %cst_71 : f32 to vector<64x1xf32>
    %160 = arith.divf %158, %159 : vector<64x1xf32>
    %cst_72 = arith.constant 9.99999974E-6 : f32
    %161 = vector.broadcast %cst_72 : f32 to vector<64x1xf32>
    %162 = arith.addf %160, %161 : vector<64x1xf32>
    %163 = math.sqrt %162 : vector<64x1xf32>
    %164 = vector.broadcast %153 : vector<64x1xf32> to vector<64x128xf32>
    %165 = arith.subf %149, %164 : vector<64x128xf32>
    %166 = vector.broadcast %163 : vector<64x1xf32> to vector<64x128xf32>
    %167 = arith.divf %165, %166 : vector<64x128xf32>
    %168 = vector.broadcast %131 : vector<64x1xf32> to vector<64x128xf32>
    %169 = arith.mulf %167, %168 : vector<64x128xf32>
    %170 = vector.broadcast %121 : vector<64x1xf32> to vector<64x128xf32>
    %171 = arith.addf %169, %170 : vector<64x128xf32>
    %172 = tpu.iota {dimensions = array<i32: 1>} : vector<64x128xi32>
    %c0_i32_73 = arith.constant 0 : i32
    %173 = vector.broadcast %c0_i32_73 : i32 to vector<64x128xi32>
    %174 = arith.cmpi eq, %172, %173 : vector<64x128xi32>
    %c1_i32_74 = arith.constant 1 : i32
    %175 = tpu.dynamic_rotate %171 by %c1_i32_74 dim 1 : vector<64x128xf32>, i32 -> vector<64x128xf32>
    %cst_75 = arith.constant 0.000000e+00 : f32
    %176 = vector.broadcast %cst_75 : f32 to vector<64x128xf32>
    %177 = arith.select %174, %176, %175 : vector<64x128xi1>, vector<64x128xf32>
    %c127_i32_76 = arith.constant 127 : i32
    %178 = vector.broadcast %c127_i32_76 : i32 to vector<64x128xi32>
    %179 = arith.cmpi eq, %172, %178 : vector<64x128xi32>
    %c127_i32_77 = arith.constant 127 : i32
    %180 = tpu.dynamic_rotate %171 by %c127_i32_77 dim 1 : vector<64x128xf32>, i32 -> vector<64x128xf32>
    %cst_78 = arith.constant 0.000000e+00 : f32
    %181 = vector.broadcast %cst_78 : f32 to vector<64x128xf32>
    %182 = arith.select %179, %181, %180 : vector<64x128xi1>, vector<64x128xf32>
    %183 = tpu.concatenate %177, %171, %182 in 0 : vector<64x128xf32>, vector<64x128xf32>, vector<64x128xf32> -> vector<192x128xf32>
    %184 = arith.truncf %183 : vector<192x128xf32> to vector<192x128xbf16>
    %cst_79 = arith.constant dense<0.000000e+00> : vector<64x128xf32>
    %185 = tpu.matmul %12, %184, %cst_79 {dimension_numbers = #tpu.dot_dimension_numbers<[1], [0], [0], [1], [0, 0, 1, 1], [], []>} : vector<64x192xbf16>, vector<192x128xbf16>, vector<64x128xf32> -> vector<64x128xf32>
    %186 = vector.broadcast %7 : vector<64x1xf32> to vector<64x128xf32>
    %187 = arith.addf %185, %186 : vector<64x128xf32>
    %cst_80 = arith.constant 0.000000e+00 : f32
    %188 = vector.broadcast %cst_80 : f32 to vector<64x128xf32>
    %189 = arith.maximumf %187, %188 : vector<64x128xf32>
    %190 = arith.addf %171, %189 : vector<64x128xf32>
    %191 = arith.truncf %190 : vector<64x128xf32> to vector<64x128xbf16>
    %cst_81 = arith.constant dense<0.000000e+00> : vector<80x128xf32>
    %192 = tpu.matmul %13, %191, %cst_81 {dimension_numbers = #tpu.dot_dimension_numbers<[1], [0], [0], [1], [0, 0, 1, 1], [], []>} : vector<80x64xbf16>, vector<64x128xbf16>, vector<80x128xf32> -> vector<80x128xf32>
    %c0_82 = arith.constant 0 : index
    %c0_83 = arith.constant 0 : index
    %193 = vector.load %arg10[%c0_82, %c0_83] : memref<80x1xf32, #tpu.memory_space<vmem>>, vector<80x1xf32>
    %194 = vector.broadcast %193 : vector<80x1xf32> to vector<80x128xf32>
    %195 = arith.addf %192, %194 : vector<80x128xf32>
    %c0_84 = arith.constant 0 : index
    %c0_85 = arith.constant 0 : index
    %c0_86 = arith.constant 0 : index
    %196 = vector.load %arg11[%c0_84, %c0_85, %c0_86] : memref<1x80x128xf32, #tpu.memory_space<vmem>>, vector<1x80x128xf32>
    %197 = vector.shape_cast %196 : vector<1x80x128xf32> to vector<80x128xf32>
    %198 = vector.shape_cast %195 : vector<80x128xf32> to vector<1x80x128xf32>
    tpu.vector_store %arg11[%c0_84, %c0_85, %c0_86], %198 {strides = array<i32>} : memref<1x80x128xf32, #tpu.memory_space<vmem>>, vector<1x80x128xf32>,
    return
  }
  func.func @transform_0(%arg0: i32) -> (i32, i32, i32) {
    %c0_i32 = arith.constant 0 : i32
    %c0_i32_0 = arith.constant 0 : i32
    %c0_i32_1 = arith.constant 0 : i32
    return %arg0, %c0_i32, %c0_i32_0 : i32, i32, i32
  }
  func.func @transform_1(%arg0: i32) -> (i32, i32) {
    %c0_i32 = arith.constant 0 : i32
    %c0_i32_0 = arith.constant 0 : i32
    %c0_i32_1 = arith.constant 0 : i32
    return %c0_i32, %c0_i32_0 : i32, i32
  }
  func.func @transform_2(%arg0: i32) -> (i32, i32) {
    %c0_i32 = arith.constant 0 : i32
    %c0_i32_0 = arith.constant 0 : i32
    %c0_i32_1 = arith.constant 0 : i32
    return %c0_i32, %c0_i32_0 : i32, i32
  }
  func.func @transform_3(%arg0: i32) -> (i32, i32) {
    %c0_i32 = arith.constant 0 : i32
    %c0_i32_0 = arith.constant 0 : i32
    %c0_i32_1 = arith.constant 0 : i32
    return %c0_i32, %c0_i32_0 : i32, i32
  }
  func.func @transform_4(%arg0: i32) -> (i32, i32) {
    %c0_i32 = arith.constant 0 : i32
    %c0_i32_0 = arith.constant 0 : i32
    %c0_i32_1 = arith.constant 0 : i32
    return %c0_i32, %c0_i32_0 : i32, i32
  }
  func.func @transform_5(%arg0: i32) -> (i32, i32) {
    %c0_i32 = arith.constant 0 : i32
    %c0_i32_0 = arith.constant 0 : i32
    %c0_i32_1 = arith.constant 0 : i32
    return %c0_i32, %c0_i32_0 : i32, i32
  }
  func.func @transform_6(%arg0: i32) -> (i32, i32) {
    %c0_i32 = arith.constant 0 : i32
    %c0_i32_0 = arith.constant 0 : i32
    %c0_i32_1 = arith.constant 0 : i32
    return %c0_i32, %c0_i32_0 : i32, i32
  }
  func.func @transform_7(%arg0: i32) -> (i32, i32) {
    %c0_i32 = arith.constant 0 : i32
    %c0_i32_0 = arith.constant 0 : i32
    %c0_i32_1 = arith.constant 0 : i32
    return %c0_i32, %c0_i32_0 : i32, i32
  }
  func.func @transform_8(%arg0: i32) -> (i32, i32) {
    %c0_i32 = arith.constant 0 : i32
    %c0_i32_0 = arith.constant 0 : i32
    %c0_i32_1 = arith.constant 0 : i32
    return %c0_i32, %c0_i32_0 : i32, i32
  }
  func.func @transform_9(%arg0: i32) -> (i32, i32) {
    %c0_i32 = arith.constant 0 : i32
    %c0_i32_0 = arith.constant 0 : i32
    %c0_i32_1 = arith.constant 0 : i32
    return %c0_i32, %c0_i32_0 : i32, i32
  }
  func.func @transform_10(%arg0: i32) -> (i32, i32, i32) {
    %c0_i32 = arith.constant 0 : i32
    %c0_i32_0 = arith.constant 0 : i32
    %c0_i32_1 = arith.constant 0 : i32
    return %arg0, %c0_i32, %c0_i32_0 : i32, i32, i32
  }
}

</mosaic_0001>

<bundles_post_ra>
// kernel: tpu_custom_call.1
= control target key start
LH: loop header
LB: loop body
LE: loop exit
PB: predicated region body
PF: predicated region fallthrough
CT: control target
= control target key end

     0   :  { %15 = vsyncpa [#allocation3], 0  ;;  %s4757_s0 = inlined_call_operand.vmem [shape: f32[2,80,128], index: 0, kind: input, shape index: {}]   ;;  %s4758_s1 = inlined_call_operand.vmem [shape: f32[64,4], index: 1, kind: input, shape index: {}]   ;;  %s4759_s2 = inlined_call_operand.vmem [shape: bf16[64,240], index: 2, kind: input, shape index: {}]   ;;  %s4760_s3 = inlined_call_operand.hbm [shape: bf16[64,192], index: 3, kind: input, shape index: {}]   ;;  %s4761_s4 = inlined_call_operand.vmem [shape: bf16[8,64], index: 4, kind: input, shape index: {}]   ;;  %s4762_s5 = inlined_call_operand.vmem [shape: f32[8,1], index: 5, kind: input, shape index: {}]   ;;  %s4763_s6 = inlined_call_operand.vmem [shape: bf16[64,24], index: 6, kind: input, shape index: {}]   ;;  %s4764_s7 = inlined_call_operand.hbm [shape: bf16[64,192], index: 7, kind: input, shape index: {}]   ;;  %s4765_s8 = inlined_call_operand.vmem [shape: bf16[80,64], index: 8, kind: input, shape index: {}]   ;;  %s4766_s9 = inlined_call_operand.vmem [shape: f32[80,1], index: 9, kind: input, shape index: {}]   ;;  %s4767_s10 = inlined_call_operand.hbm [shape: f32[2,80,128], index: 10, kind: output, shape index: {}]  }
   0x1   :  { %16 = vsyncpa [#allocation6], 0 }
   0x2   :  { %17 = vsyncpa [#allocation4], 0 }
   0x3   :  { %19 = vsyncpa [#allocation4 + $0x1], 0  ;;  %s3414_s13 = smov 0   ;;  %s3416_s14 = smov 0  }
   0x4   :  { %s3418_s15 = smov 0   ;;  %s3420_s16 = smov 0  }
   0x5 LB: > { %s3435_s17 = sadd.s32 4294967295, %s3340_s16   ;;  %s2370_s18 = sadd.s32 4294967294, %s3340_s16   ;;  %s3340_s16 = sphi %s3420_s16, %s4806_s16   ;;  %s3336_s15 = sphi %s3418_s15, %s4805_s15   ;;  %s3332_s14 = sphi %s3416_s14, %s4804_s14   ;;  %s3328_s13 = sphi %s3414_s13, %s4803_s13  }
   0x6   : > { %s3439_s19 = sadd.s32 1, %s3340_s16   ;;  %s247_s20 = sadd.s32 1, %s3336_s15 }
   0x7   : > { %s244_s21 = ssub.s32 %s3340_s16, %s3439_s19  ;;  %p257_p0 = scmp.ne.s32.totalorder %s3336_s15, %s3332_s14 }
   0x8   : > { %p245_p1 = scmp.eq.s32.totalorder %s244_s21, 0  ;;  %p258_p2 = scmp.eq.s32.totalorder %s3435_s17, 1 }
   0x9   : > { %p263_p3 = scmp.ne.s32.totalorder %s3332_s14, %s3328_s13  ;;  %p264_p4 = scmp.eq.s32.totalorder %s2370_s18, 1 }
   0xa   : > { %s3450_s22 = scalar_select %p245_p1, %s3336_s15, %s247_s20  }
   0xb   : > { %p3452_p5 = por %p258_p2, %p257_p0  ;;  %p3456_p6 = por %p264_p4, %p263_p3 }
   0xc   : > { %p2371_p7 = scmp.ge.s32.totalorder %s3340_s16, 1  ;;  %p271_p8 = scmp.lt.s32.totalorder %s3340_s16, 3 }
   0xd   : > { %s4778_s24 = scalar_select %p3456_p6, 1, 0 }
   0xe   : > { %p4768_p9 = scmp.eq.s32.totalorder %s3435_s17, 0  ;;  %p3463_p10 = pnand %p2371_p7, %p271_p8 }
   0xf   : > { %s3342_s26 = smov [#allocation2]   ;;  %s3343_s29 = smov [#allocation5]  }
  0x10   : > { %s289_s27 = sshll.u32 %s3342_s26, 4  ;;  %p2756_p11 = pneg %p3463_p10  ;;  %s290_s27 = int_to_ptr.vmem [resolvable:$true] %s289_s27 }
  0x11   : > { %s311_s30 = sshll.u32 %s3343_s29, 4  ;;  %s3231_s11 = scalar_lea.vmem %s290_s27, 1024  ;;  %s312_s30 = int_to_ptr.vmem [resolvable:$true] %s311_s30 }
  0x12   : > { %p3471_p12 = pnand %p4768_p9, %p2756_p11  ;;  %p3232_p0 = scmp.ne.s32.totalorder %s290_s27, %s3231_s11 }
  0x13   : > { %p3239_p3 = scmp.lt.s32.totalorder %s290_s27, %s290_s27  ;;  %p3240_p4 = scmp.lt.s32.totalorder %s3231_s11, %s3231_s11 }
  0x14   : > { %p3222_p13 = pneg %p3471_p12 }
  0x15   : > { %p3241_p7 = por %p3240_p4, %p3239_p3 }
  0x16   : > { %p3234_p1 = pnand %p3232_p0, %p3222_p13 }
  0x18   : > { %p3235_p2 = pneg %p3234_p1 }
  0x1a   : > { %p3242_p8 = pnand %p3241_p7, %p3235_p2 }
  0x1c   : > { %3245 = shalt.err (!%p3242_p8)
}
  0x1d   : > { %s3344_s12 = smov 128   ;;  %s3345_s18 = smov 8  }
  0x1e   : > { %2759 = dma.hbm_to_vmem [thread:$0]  (!%p3471_p12), %s4760_s3, 1024, %s290_s27, [#allocation3], %s3344_s12, %s3344_s12, %s3345_s18  }
  0x1f   : > { %s3257_s26 = scalar_lea.vmem %s312_s30, 1024  ;;  %p3265_p9 = scmp.lt.s32.totalorder %s312_s30, %s312_s30 }
  0x20   : > { %p3258_p11 = scmp.ne.s32.totalorder %s312_s30, %s3257_s26  ;;  %p3266_p6 = scmp.lt.s32.totalorder %s3257_s26, %s3257_s26 }
  0x22   : > { %p3260_p0 = pnand %p3258_p11, %p3222_p13  ;;  %p3267_p3 = por %p3266_p6, %p3265_p9 }
  0x24   : > { %p3261_p1 = pneg %p3260_p0 }
  0x26   : > { %p3268_p2 = pnand %p3267_p3, %p3261_p1 }
  0x28   : > { %3271 = shalt.err (!%p3268_p2)
}
  0x29   : > { %2762 = dma.hbm_to_vmem [thread:$0]  (!%p3471_p12), %s4764_s7, 1024, %s312_s30, [#allocation6], %s3344_s12, %s3344_s12, %s3345_s18  }
  0x2a   : > { %341 = sbr.rel (%p3463_p10) target bundleno = 2744 (0xab8), region = 60 }
  0x2f   : > { %p4781_p4 = scmp.eq.s32.totalorder %s3435_s17, 0 }
  0x31   : > { %3315 = dma.done.wait (%p4781_p4), [#allocation3], 1024   ;;  %p4782_p13 = pmov %p4781_p4 }
  0x32   : > { %p4783_p7 = pmov %p4781_p4 }
  0x33   : > { %3317 = vsyncadd (%p4782_p13), [#allocation3], 4294966272 }
  0x34   : > { %3319 = dma.done.wait (%p4783_p7), [#allocation6], 1024   ;;  %p4784_p6 = pmov %p4781_p4 }
  0x35   : > { %p383_p9 = scmp.lt.s32.totalorder %s3435_s17, 1  ;;  %v4771_v0 = vmov 0   ;;  %s3347_s18 = smov 1   ;;  %v3560_v19 = vld [vmem:[%s4759_s2 + $0x4] ss:$8 sps:$4 sm:$0xff]   ;;  %vm625_vm0 = vcmask 916480   ;;  %v470_v28 = vlaneseq }
  0x36   : > { %3321 = vsyncadd (%p4784_p6), [#allocation6], 4294966272  ;;  %638 = vmatprep.subr.bf16.mxu0 %v4771_v0  ;;  %2871 = vset.pattern.permute.xlu1 %v4771_v0  ;;  %s3348_s20 = smov 127   ;;  %v3567_v20 = vld [vmem:[%s4758_s1 + $0x38] sm:$0xff]  ;;  %v3572_v21 = vld [vmem:[%s4758_s1 + $0x30] sm:$0xff]  ;;  %vm839_vm6 = vcmask 523264  }
  0x37   : > { %s384_s25 = scalar_select %p383_p9, %s3435_s17, 1  ;;  %2870 = vset.pattern.permute.xlu0 %v4771_v0  ;;  %852 = vmatprep.subr.bf16.mxu1 %v4771_v0  ;;  %v3579_v22 = vld [vmem:[%s4758_s1 + $0x20] sm:$0xff]  ;;  %v3584_v23 = vld [vmem:[%s4758_s1 + $0x28] sm:$0xff]  ;;  %v3591_v24 = vld [vmem:[%s4758_s1 + $0x10] sm:$0xff]  ;;  %v3612_v29 = vand.u32 127, %v470_v28  ;;  %vm3352_vm7 = vmmov 0  }
  0x38   : > { %2437 = vmatprep.mubr.msk.bf16.mxu0 %vm625_vm0, %v3560_v19  ;;  %v3596_v25 = vld [vmem:[%s4758_s1 + $0x18] sm:$0xff]  ;;  %v3603_v26 = vld [vmem:[%s4758_s1] sm:$0xff]  ;;  %v3608_v27 = vld [vmem:[%s4758_s1 + $0x8] sm:$0xff]  ;;  %s3356_s29 = smov [#allocation7]  }
  0x39   : > { %s2744_s27 = smul.u32 80, %s384_s25  ;;  %vm2669_vm1 = vcmp.ne.s32.totalorder %v3612_v29, 0  ;;  %vm503_vm3 = vcmp.eq.s32.totalorder %v3612_v29, 127  ;;  %v2090_v58 = vld [vmem:[%s4766_s9 + $0x8] sm:$0xff]  ;;  %s380_s25 = sand.u32 1, %s3332_s14  }
  0x3a   : > { %vm3618_vm2 = vmpackc.low %vm2669_vm1, %vm2669_vm1  ;;  %s3276_s11 = sshll.u32 %s3356_s29, 4  ;;  %s3277_s11 = int_to_ptr.vmem [resolvable:$false] %s3276_s11 }
  0x3b   : > { %s387_s12 = scalar_lea.vmem %s4757_s0, %s2744_s27  ;;  %vm2412_vm4 = vmneg %vm503_vm3  ;;  %s3350_s27 = smov 64  }
  0x3c   : > { %v3512_v1 = vld [vmem:[%s387_s12 + $0x40] sm:$0xff]  ;;  %v3514_v2 = vld [vmem:[%s387_s12 + $0x48] sm:$0xff]  ;;  %v3516_v3 = vld [vmem:[%s387_s12 + $0x30] sm:$0xff] }
  0x3d   : > { %v3520_v4 = vpack.i.bf16 %v3514_v2, %v3512_v1  ;;  %v3522_v5 = vld [vmem:[%s387_s12 + $0x38] sm:$0xff]  ;;  %v393_v6 = vld [vmem:[%s387_s12 + $0x20] sm:$0xff]  ;;  %v394_v7 = vld [vmem:[%s387_s12 + $0x28] sm:$0xff] }
  0x3e   : > { %v3524_v8 = vpack.i.bf16 %v394_v7, %v393_v6  ;;  %v391_v9 = vld [vmem:[%s387_s12 + $0x10] sm:$0xff]  ;;  %v392_v10 = vld [vmem:[%s387_s12 + $0x18] sm:$0xff]  ;;  %v389_v11 = vld [vmem:[%s387_s12] sm:$0xff]  ;;  %v3530_v12 = vpack.i.bf16 %v3522_v5, %v3516_v3  ;;  %v541_v14 = vpack.c.bf16 %v394_v7, %v393_v6  ;;  %v542_v28 = vpack.c.bf16 %v3522_v5, %v3516_v3 }
  0x3f   : > { %2821 = vrot.lane.b32.xlu0 %v3520_v4, %s3347_s18  ;;  %v390_v13 = vld [vmem:[%s387_s12 + $0x8] sm:$0xff]  ;;  %v3534_v15 = vpack.i.bf16 %v392_v10, %v391_v9  ;;  %v540_v16 = vpack.c.bf16 %v392_v10, %v391_v9  ;;  %vm3640_vm5 = vmpackc.low %vm2412_vm4, %vm2412_vm4  ;;  %v3699_v5 = vld [vmem:[%s4759_s2 + $0x34] ss:$8 sps:$4 sm:$0xff]  }
  0x40   : > { %2831 = vrot.lane.b32.xlu1 %v3524_v8, %s3347_s18  ;;  %639 = vmatpush1.bf16.msra.mxu0 %v541_v14  ;;  %v3539_v17 = vpack.i.bf16 %v390_v13, %v389_v11  ;;  %v539_v18 = vpack.c.bf16 %v390_v13, %v389_v11  ;;  %v3694_v3 = vld [vmem:[%s4759_s2 + $0x20] ss:$8 sps:$4 sm:$0xff]  }
  0x41   : > { %640 = vmatprep.subr.bf16.mxu0 %v4771_v0 }
  0x43   : > { %2826 = vrot.lane.b32.xlu0 %v3530_v12, %s3347_s18 }
  0x44   : > { %2836 = vrot.lane.b32.xlu1 %v3534_v15, %s3347_s18  ;;  %641 = vmatpush1.bf16.msra.mxu0 %v540_v16 }
  0x45   : > { %642 = vmatprep.subr.bf16.mxu0 %v4771_v0 }
  0x47   : > { %2841 = vrot.lane.b32.xlu0 %v3539_v17, %s3347_s18 }
  0x48   : > { %2846 = vrot.lane.b32.xlu1 %v3520_v4, %s3348_s20  ;;  %643 = vmatpush1.bf16.msra.mxu0 %v539_v18  ;;  %v543_v18 = vpack.c.bf16 %v3514_v2, %v3512_v1  ;;  %v3681_v1 = vld [vmem:[%s4759_s2 + $0x10] ss:$8 sps:$4 sm:$0xff]   ;;  %v3686_v2 = vld [vmem:[%s4759_s2 + $0x24] ss:$8 sps:$4 sm:$0xff]  }
  0x49   : > { %644 = vmatprep.subr.bf16.mxu0 %v4771_v0 }
  0x4b   : > { %2851 = vrot.lane.b32.xlu0 %v3530_v12, %s3348_s20 }
  0x4c   : > { %2856 = vrot.lane.b32.xlu1 %v3524_v8, %s3348_s20 }
  0x4f   : > { %2861 = vrot.lane.b32.xlu0 %v3534_v15, %s3348_s20 }
  0x50   : > { %2866 = vrot.lane.b32.xlu1 %v3539_v17, %s3348_s20 }
  0x53   : > { %581 = vperm.xlu0 %2870, %v3572_v21  }
  0x54   : > { %586 = vperm.xlu1 %2871, %v3567_v20  }
  0x57   : > { %576 = vperm.xlu0 %2870, %v3584_v23  }
  0x58   : > { %571 = vperm.xlu1 %2871, %v3579_v22  }
  0x5b   : > { %566 = vperm.xlu0 %2870, %v3596_v25  }
  0x5c   : > { %561 = vperm.xlu1 %2871, %v3591_v24  }
  0x5f   : > { %556 = vperm.xlu0 %2870, %v3608_v27  }
  0x60   : > { %551 = vperm.xlu1 %2871, %v3603_v26  }
  0xb1   : > { %v2822_v30 = vpop.permute.xlu0 %2821 }
  0xb2   : > { %v2824_v31 = vunpack.i.h.bf16 %v2822_v30  ;;  %v2823_v32 = vunpack.i.l.bf16 %v2822_v30  ;;  %v2832_v33 = vpop.permute.xlu1 %2831  ;;  %v3667_v30 = vld [vmem:[%s4759_s2] ss:$8 sps:$4 sm:$0xff]  }
  0xb3   : > { %v2834_v39 = vunpack.i.h.bf16 %v2832_v33  ;;  %v2833_v40 = vunpack.i.l.bf16 %v2832_v33 }
  0xb4   : > { %v2390_v35 = vpack.c.bf16 %v2824_v31, %v2823_v32  ;;  %v3672_v31 = vld [vmem:[%s4759_s2 + $0x14] ss:$8 sps:$4 sm:$0xff]   ;;  %v3707_v32 = vld [vmem:[%s4759_s2 + $0x30] ss:$8 sps:$4 sm:$0xff]  }
  0xb5   : > { %v2827_v36 = vpop.permute.xlu0 %2826  ;;  %v2400_v43 = vpack.c.bf16 %v2834_v39, %v2833_v40 }
  0xb6   : > { %v2829_v37 = vunpack.i.h.bf16 %v2827_v36  ;;  %v2828_v38 = vunpack.i.l.bf16 %v2827_v36  ;;  %2391 = vmatpush1.bf16.msk.msra.mxu0 %vm3618_vm2, %v2390_v35  ;;  %v2837_v41 = vpop.permute.xlu1 %2836 }
  0xb7   : > { %646 = vmatprep.subr.bf16.mxu0 %v4771_v0  ;;  %v2839_v44 = vunpack.i.h.bf16 %v2837_v41  ;;  %v2838_v45 = vunpack.i.l.bf16 %v2837_v41 }
  0xb8   : > { %v2395_v42 = vpack.c.bf16 %v2829_v37, %v2828_v38 }
  0xb9   : > { %v2842_v46 = vpop.permute.xlu0 %2841  ;;  %v2405_v47 = vpack.c.bf16 %v2839_v44, %v2838_v45 }
  0xba   : > { %2396 = vmatpush1.bf16.msk.msra.mxu0 %vm3618_vm2, %v2395_v42  ;;  %v2844_v48 = vunpack.i.h.bf16 %v2842_v46  ;;  %v2843_v49 = vunpack.i.l.bf16 %v2842_v46  ;;  %v2847_v50 = vpop.permute.xlu1 %2846 }
  0xbb   : > { %648 = vmatprep.subr.bf16.mxu0 %v4771_v0  ;;  %v2849_v52 = vunpack.i.h.bf16 %v2847_v50  ;;  %v2848_v53 = vunpack.i.l.bf16 %v2847_v50 }
  0xbc   : > { %v2410_v51 = vpack.c.bf16 %v2844_v48, %v2843_v49 }
  0xbd   : > { %v2852_v54 = vpop.permute.xlu0 %2851  ;;  %v2415_v55 = vpack.c.bf16 %v2849_v52, %v2848_v53 }
  0xbe   : > { %2401 = vmatpush1.bf16.msk.msra.mxu0 %vm3618_vm2, %v2400_v43  ;;  %v2854_v56 = vunpack.i.h.bf16 %v2852_v54  ;;  %v2853_v57 = vunpack.i.l.bf16 %v2852_v54  ;;  %v2857_v59 = vpop.permute.xlu1 %2856 }
  0xbf   : > { %650 = vmatprep.subr.bf16.mxu0 %v4771_v0  ;;  %v2859_v61 = vunpack.i.h.bf16 %v2857_v59  ;;  %v2858_v62 = vunpack.i.l.bf16 %v2857_v59 }
  0xc0   : > { %v2420_v60 = vpack.c.bf16 %v2854_v56, %v2853_v57 }
  0xc1   : > { %v2862_v63 = vpop.permute.xlu0 %2861  ;;  %v2425_v6 = vpack.c.bf16 %v2859_v61, %v2858_v62 }
  0xc2   : > { %2406 = vmatpush1.bf16.msk.msra.mxu0 %vm3618_vm2, %v2405_v47  ;;  %v2864_v7 = vunpack.i.h.bf16 %v2862_v63  ;;  %v2863_v9 = vunpack.i.l.bf16 %v2862_v63  ;;  %v2867_v10 = vpop.permute.xlu1 %2866 }
  0xc3   : > { %652 = vmatprep.subr.bf16.mxu0 %v4771_v0  ;;  %v2869_v13 = vunpack.i.h.bf16 %v2867_v10  ;;  %v2868_v14 = vunpack.i.l.bf16 %v2867_v10 }
  0xc4   : > { %v2430_v11 = vpack.c.bf16 %v2864_v7, %v2863_v9 }
  0xc5   : > { %v2435_v16 = vpack.c.bf16 %v2869_v13, %v2868_v14 }
  0xc6   : > { %2411 = vmatpush1.bf16.msk.msra.mxu0 %vm3618_vm2, %v2410_v51 }
  0xc7   : > { %656 = vmatprep.subr.bf16.mxu0 %v4771_v0 }
  0xca   : > { %2416 = vmatpush2.bf16.msk.msra.mxu0 %vm3640_vm5, %v2415_v55 }
  0xcb   : > { %658 = vmatprep.subr.bf16.mxu0 %v4771_v0 }
  0xce   : > { %2421 = vmatpush2.bf16.msk.msra.mxu0 %vm3640_vm5, %v2420_v60  ;;  %v3712_v33 = vpop.permute.xlu0 %581 }
  0xcf   : > { %660 = vmatprep.subr.bf16.mxu0 %v4771_v0  ;;  %v3714_v36 = vpop.permute.xlu1 %586 }
  0xd2   : > { %2426 = vmatpush2.bf16.msk.msra.mxu0 %vm3640_vm5, %v2425_v6  ;;  %v3716_v39 = vpop.permute.xlu0 %576 }
  0xd3   : > { %662 = vmatprep.subr.bf16.mxu0 %v4771_v0  ;;  %v3718_v41 = vpop.permute.xlu1 %571 }
  0xd6   : > { %2431 = vmatpush2.bf16.msk.msra.mxu0 %vm3640_vm5, %v2430_v11  ;;  %v3720_v44 = vpop.permute.xlu0 %566 }
  0xd7   : > { %664 = vmatprep.subr.bf16.mxu0 %v4771_v0  ;;  %v3722_v46 = vpop.permute.xlu1 %561 }
  0xda   : > { %2436 = vmatpush2.bf16.msk.msra.mxu0 %vm3640_vm5, %v2435_v16  ;;  %v3724_v48 = vpop.permute.xlu0 %556 }
  0xdb   : > { %666 = vmatprep.subr.bf16.mxu0 %v4771_v0  ;;  %v3727_v51 = vpop.permute.xlu1 %551 }
  0xde   : > { %667 = vmatpush2.bf16.msra.mxu0 %v543_v18 }
  0xdf   : > { %668 = vmatprep.subr.bf16.mxu0 %v4771_v0 }
  0xe2   : > { %669 = vmatpush2.bf16.msra.mxu0 %v542_v28 }
  0xe3   : > { %1212 = vmatprep.subr.bf16.mxu0 %v4771_v0 }
  0xe5   : > { %671 = vmatmul.mubr.bf16.vlgmr.msra.gmra.mxu0 %v3667_v30 }
  0xe6   : > { %2438 = vmatprep.mubr.msk.bf16.mxu0 %vm625_vm0, %v3672_v31 }
  0xed   : > { %679 = vmatmul.mubr.bf16.gmra.mxu0 %v3681_v1 }
  0xee   : > { %2439 = vmatprep.mubr.msk.bf16.mxu0 %vm625_vm0, %v3686_v2 }
  0xf5   : > { %687 = vmatmul.mubr.bf16.gmra.mxu0 %v3694_v3 }
  0xf6   : > { %2440 = vmatprep.mubr.msk.bf16.mxu0 %vm625_vm0, %v3699_v5 }
  0xfd   : > { %695 = vmatmul.mubr.bf16.gmra.mxu0 %v3707_v32 }
  0xfe   : > { %2544 = vmatprep.mubr.msk.bf16.mxu0 %vm625_vm0, %v3560_v19 }
 0x1a5   : > { %v672_v35 = vpop.f32.mrf.mxu0 }
 0x1a6   : > { %v673_v56 = vadd.f32 %v672_v35, %v3727_v51 }
 0x1a7   : > { %v674_v37 = vpop.f32.mrf.mxu0 }
 0x1a8   : > { %v3740_v6 = vmax.f32 %v673_v56, 0.0 }
 0x1a9   : > { %v675_v38 = vpop.f32.mrf.mxu0 }
 0x1aa   : > { %v676_v53 = vadd.f32 %v675_v38, %v3724_v48 }
 0x1ab   : > { %v677_v40 = vpop.f32.mrf.mxu0 }
 0x1ac   : > { %v3736_v61 = vmax.f32 %v676_v53, 0.0 }
 0x1ad   : > { %v680_v42 = vpop.f32.mrf.mxu0 }
 0x1ae   : > { %v2887_v13 = vpack.i.bf16 %v3736_v61, %v3740_v6  ;;  %v681_v16 = vadd.f32 %v680_v42, %v3722_v46 }
 0x1af   : > { %v682_v43 = vpop.f32.mrf.mxu0 }
 0x1b0   : > { %v3760_v40 = vmax.f32 %v681_v16, 0.0 }
 0x1b1   : > { %v683_v45 = vpop.f32.mrf.mxu0 }
 0x1b2   : > { %v684_v10 = vadd.f32 %v683_v45, %v3720_v44 }
 0x1b3   : > { %v685_v19 = vpop.f32.mrf.mxu0 }
 0x1b4   : > { %v3754_v35 = vmax.f32 %v684_v10, 0.0  ;;  %v763_v19 = vpack.c.bf16 %v3736_v61, %v3740_v6 }
 0x1b5   : > { %v688_v47 = vpop.f32.mrf.mxu0 }
 0x1b6   : > { %v689_v50 = vadd.f32 %v688_v47, %v3718_v41  ;;  %v2882_v43 = vpack.i.bf16 %v3754_v35, %v3760_v40  ;;  %v764_v45 = vpack.c.bf16 %v3754_v35, %v3760_v40  ;;  %v3780_v47 = vld [vmem:[#allocation2 + $0x4] ss:$8 sps:$4 sm:$0xff]  }
 0x1b7   : > { %v690_v49 = vpop.f32.mrf.mxu0  ;;  %2489 = vmatprep.mubr.msk.bf16.mxu1 %vm839_vm6, %v3780_v47 }
 0x1b8   : > { %v3732_v57 = vmax.f32 %v689_v50, 0.0  ;;  %v3349_v49 = vmov 1  }
 0x1b9   : > { %v691_v52 = vpop.f32.mrf.mxu0  ;;  %2912 = vset.pattern.permute.xlu1 %v3349_v49  ;;  %2913 = vset.pattern.permute.xlu0 %v3349_v49  ;;  %v3093_v49 = vld [vmem:[#allocation2 + $0x10] ss:$8 sps:$4 sm:$0xff]  }
 0x1ba   : > { %v692_v54 = vadd.f32 %v691_v52, %v3716_v39 }
 0x1bb   : > { %v693_v55 = vpop.f32.mrf.mxu0 }
 0x1bc   : > { %v3734_v59 = vmax.f32 %v692_v54, 0.0 }
 0x1bd   : > { %v696_v60 = vpop.f32.mrf.mxu0 }
 0x1be   : > { %v2877_v62 = vpack.i.bf16 %v3734_v59, %v3732_v57  ;;  %v697_v7 = vadd.f32 %v696_v60, %v3712_v33  ;;  %v765_v42 = vpack.c.bf16 %v3734_v59, %v3732_v57 }
 0x1bf   : > { %v698_v63 = vpop.f32.mrf.mxu0 }
 0x1c0   : > { %2878 = vrot.lane.b32.xlu0 %v2877_v62, %s3347_s18  ;;  %v3749_v18 = vmax.f32 %v697_v7, 0.0 }
 0x1c1   : > { %v699_v9 = vpop.f32.mrf.mxu0 }
 0x1c2   : > { %v700_v11 = vadd.f32 %v699_v9, %v3714_v36 }
 0x1c3   : > { %v701_v14 = vpop.f32.mrf.mxu0 }
 0x1c4   : > { %v3751_v28 = vmax.f32 %v700_v11, 0.0  ;;  %2888 = vrot.lane.b32.xlu0 %v2887_v13, %s3347_s18 }
 0x1c6   : > { %v2872_v37 = vpack.i.bf16 %v3751_v28, %v3749_v18  ;;  %v766_v38 = vpack.c.bf16 %v3751_v28, %v3749_v18 }
 0x1c8   : > { %2873 = vrot.lane.b32.xlu1 %v2872_v37, %s3347_s18  ;;  %853 = vmatpush1.bf16.msra.mxu1 %v766_v38 }
 0x1c9   : > { %2898 = vrot.lane.b32.xlu0 %v2877_v62, %s3348_s20  ;;  %854 = vmatprep.subr.bf16.mxu1 %v4771_v0 }
 0x1cc   : > { %855 = vmatpush1.bf16.msra.mxu1 %v765_v42  ;;  %2883 = vrot.lane.b32.xlu1 %v2882_v43, %s3347_s18 }
 0x1cd   : > { %2908 = vrot.lane.b32.xlu0 %v2887_v13, %s3348_s20  ;;  %856 = vmatprep.subr.bf16.mxu1 %v4771_v0 }
 0x1d0   : > { %2893 = vrot.lane.b32.xlu1 %v2872_v37, %s3348_s20  ;;  %857 = vmatpush1.bf16.msra.mxu1 %v764_v45  ;;  %v3088_v45 = vld [vmem:[#allocation2] ss:$8 sps:$4 sm:$0xff]  }
 0x1d1   : > { %858 = vmatprep.subr.bf16.mxu1 %v4771_v0  ;;  %800 = vperm.xlu0 %2913, %v3567_v20  }
 0x1d4   : > { %2903 = vrot.lane.b32.xlu1 %v2882_v43, %s3348_s20  ;;  %859 = vmatpush1.bf16.msra.mxu1 %v763_v19  ;;  %v3091_v19 = vld [vmem:[#allocation2 + $0x14] ss:$8 sps:$4 sm:$0xff]  }
 0x1d5   : > { %860 = vmatprep.subr.bf16.mxu1 %v4771_v0  ;;  %780 = vperm.xlu0 %2913, %v3591_v24  }
 0x1d8   : > { %796 = vperm.xlu1 %2912, %v3572_v21  }
 0x1d9   : > { %772 = vperm.xlu0 %2913, %v3603_v26  }
 0x1dc   : > { %788 = vperm.xlu1 %2912, %v3579_v22  }
 0x1dd   : > { %2920 = vrot.lane.b32.xlu0 %v3530_v12, %s3350_s27 }
 0x1e0   : > { %792 = vperm.xlu1 %2912, %v3584_v23  }
 0x1e4   : > { %784 = vperm.xlu1 %2912, %v3596_v25  }
 0x1e8   : > { %776 = vperm.xlu1 %2912, %v3608_v27  }
 0x1ec   : > { %2915 = vrot.lane.b32.xlu1 %v3520_v4, %s3350_s27 }
 0x1ed   : > { %2989 = vset.pattern.permute.xlu1 %v4771_v0 }
 0x1f0   : > { %2925 = vrot.lane.b32.xlu1 %v3524_v8, %s3350_s27 }
 0x1f4   : > { %2930 = vrot.lane.b32.xlu1 %v3534_v15, %s3350_s27 }
 0x232   : > { %v2879_v20 = vpop.permute.xlu0 %2878 }
 0x233   : > { %v2881_v24 = vunpack.i.h.bf16 %v2879_v20  ;;  %v2880_v25 = vunpack.i.l.bf16 %v2879_v20  ;;  %v3094_v20 = vld [vmem:[#allocation2 + $0x24] ss:$8 sps:$4 sm:$0xff]  }
 0x235   : > { %v2457_v4 = vpack.c.bf16 %v2881_v24, %v2880_v25 }
 0x236   : > { %v2889_v8 = vpop.permute.xlu0 %2888 }
 0x237   : > { %v2891_v15 = vunpack.i.h.bf16 %v2889_v8  ;;  %v2890_v52 = vunpack.i.l.bf16 %v2889_v8 }
 0x239   : > { %v2467_v55 = vpack.c.bf16 %v2891_v15, %v2890_v52 }
 0x23a   : > { %v2874_v21 = vpop.permute.xlu1 %2873 }
 0x23b   : > { %v2876_v22 = vunpack.i.h.bf16 %v2874_v21  ;;  %v2875_v23 = vunpack.i.l.bf16 %v2874_v21  ;;  %v2899_v62 = vpop.permute.xlu0 %2898  ;;  %v3096_v21 = vld [vmem:[#allocation2 + $0x20] ss:$8 sps:$4 sm:$0xff]  }
 0x23c   : > { %v2901_v63 = vunpack.i.h.bf16 %v2899_v62  ;;  %v2900_v7 = vunpack.i.l.bf16 %v2899_v62 }
 0x23d   : > { %v2452_v12 = vpack.c.bf16 %v2876_v22, %v2875_v23  ;;  %v3097_v22 = vld [vmem:[#allocation2 + $0x34] ss:$8 sps:$4 sm:$0xff]   ;;  %v3099_v23 = vld [vmem:[#allocation2 + $0x30] ss:$8 sps:$4 sm:$0xff]  }
 0x23e   : > { %v2884_v26 = vpop.permute.xlu1 %2883  ;;  %v2477_v11 = vpack.c.bf16 %v2901_v63, %v2900_v7 }
 0x23f   : > { %2453 = vmatpush1.bf16.msk.msra.mxu1 %vm3618_vm2, %v2452_v12  ;;  %v2886_v27 = vunpack.i.h.bf16 %v2884_v26  ;;  %v2885_v50 = vunpack.i.l.bf16 %v2884_v26  ;;  %v2909_v16 = vpop.permute.xlu0 %2908 }
 0x240   : > { %862 = vmatprep.subr.bf16.mxu1 %v4771_v0  ;;  %v2911_v37 = vunpack.i.h.bf16 %v2909_v16  ;;  %v2910_v38 = vunpack.i.l.bf16 %v2909_v16 }
 0x241   : > { %v2462_v53 = vpack.c.bf16 %v2886_v27, %v2885_v50 }
 0x242   : > { %v2894_v54 = vpop.permute.xlu1 %2893  ;;  %v2487_v43 = vpack.c.bf16 %v2911_v37, %v2910_v38 }
 0x243   : > { %2458 = vmatpush1.bf16.msk.msra.mxu1 %vm3618_vm2, %v2457_v4  ;;  %v2896_v56 = vunpack.i.h.bf16 %v2894_v54  ;;  %v2895_v60 = vunpack.i.l.bf16 %v2894_v54 }
 0x244   : > { %864 = vmatprep.subr.bf16.mxu1 %v4771_v0 }
 0x245   : > { %v2472_v9 = vpack.c.bf16 %v2896_v56, %v2895_v60 }
 0x246   : > { %v2904_v10 = vpop.permute.xlu1 %2903 }
 0x247   : > { %2463 = vmatpush1.bf16.msk.msra.mxu1 %vm3618_vm2, %v2462_v53  ;;  %v2906_v13 = vunpack.i.h.bf16 %v2904_v10  ;;  %v2905_v14 = vunpack.i.l.bf16 %v2904_v10 }
 0x248   : > { %866 = vmatprep.subr.bf16.mxu1 %v4771_v0 }
 0x249   : > { %v2482_v42 = vpack.c.bf16 %v2906_v13, %v2905_v14 }
 0x24b   : > { %2468 = vmatpush1.bf16.msk.msra.mxu1 %vm3618_vm2, %v2467_v55 }
 0x24c   : > { %876 = vmatprep.subr.bf16.mxu1 %v4771_v0  ;;  %v3853_v7 = vpop.permute.xlu0 %800 }
 0x24d   : > { %4791 = vst [vmem:[#allocation13_spill] sm:$0xff] %v3853_v7 }
 0x24f   : > { %2473 = vmatpush2.bf16.msk.msra.mxu1 %vm3640_vm5, %v2472_v9 }
 0x250   : > { %878 = vmatprep.subr.bf16.mxu1 %v4771_v0  ;;  %v3855_v9 = vpop.permute.xlu0 %780 }
 0x253   : > { %2478 = vmatpush2.bf16.msk.msra.mxu1 %vm3640_vm5, %v2477_v11  ;;  %v3827_v24 = vpop.permute.xlu1 %796 }
 0x254   : > { %880 = vmatprep.subr.bf16.mxu1 %v4771_v0  ;;  %v3857_v10 = vpop.permute.xlu0 %772 }
 0x255   : > { %4792 = vst [vmem:[#allocation14_spill] sm:$0xff] %v3857_v10 }
 0x257   : > { %2483 = vmatpush2.bf16.msk.msra.mxu1 %vm3640_vm5, %v2482_v42  ;;  %v3829_v25 = vpop.permute.xlu1 %788 }
 0x258   : > { %882 = vmatprep.subr.bf16.mxu1 %v4771_v0 }
 0x25b   : > { %2488 = vmatpush2.bf16.msk.msra.mxu1 %vm3640_vm5, %v2487_v43  ;;  %v3831_v12 = vpop.permute.xlu1 %792 }
 0x25e   : > { %885 = vmatmul.mubr.bf16.vlgmr.msra.gmra.mxu1 %v3088_v45 }
 0x25f   : > { %2490 = vmatprep.mubr.msk.bf16.mxu1 %vm839_vm6, %v3091_v19  ;;  %v3833_v26 = vpop.permute.xlu1 %784 }
 0x260   : > { %4789 = vst [vmem:[#allocation11_spill] sm:$0xff] %v3833_v26 }
 0x263   : > { %v3835_v4 = vpop.permute.xlu1 %776 }
 0x264   : > { %4790 = vst [vmem:[#allocation12_spill] sm:$0xff] %v3835_v4 }
 0x266   : > { %893 = vmatmul.mubr.bf16.gmra.mxu1 %v3093_v49 }
 0x267   : > { %2491 = vmatprep.mubr.msk.bf16.mxu1 %vm839_vm6, %v3094_v20  ;;  %v3837_v27 = vpop.permute.xlu1 %2915 }
 0x268   : > { %v2918_v50 = vunpack.i.h.bf16 %v3837_v27  ;;  %v2917_v8 = vunpack.i.l.bf16 %v3837_v27 }
 0x26a   : > { %v3841_v15 = vpack.c.bf16 %v2918_v50, %v2917_v8 }
 0x26b   : > { %v3843_v52 = vpop.permute.xlu1 %2925 }
 0x26c   : > { %v2928_v53 = vunpack.i.h.bf16 %v3843_v52  ;;  %v2927_v54 = vunpack.i.l.bf16 %v3843_v52 }
 0x26e   : > { %901 = vmatmul.mubr.bf16.gmra.mxu1 %v3096_v21  ;;  %v1204_v55 = vpack.c.bf16 %v2928_v53, %v2927_v54 }
 0x26f   : > { %2492 = vmatprep.mubr.msk.bf16.mxu1 %vm839_vm6, %v3097_v22  ;;  %v3848_v56 = vpop.permute.xlu1 %2930 }
 0x270   : > { %1213 = vmatpush1.bf16.msra.mxu0 %v1204_v55  ;;  %v2933_v60 = vunpack.i.h.bf16 %v3848_v56  ;;  %v2932_v62 = vunpack.i.l.bf16 %v3848_v56 }
 0x271   : > { %1214 = vmatprep.subr.bf16.mxu0 %v4771_v0 }
 0x272   : > { %v1203_v63 = vpack.c.bf16 %v2933_v60, %v2932_v62 }
 0x274   : > { %1215 = vmatpush1.bf16.msra.mxu0 %v1203_v63 }
 0x275   : > { %1216 = vmatprep.subr.bf16.mxu0 %v4771_v0 }
 0x276   : > { %909 = vmatmul.mubr.bf16.gmra.mxu1 %v3099_v23 }
 0x31e   : > { %v886_v11 = vpop.f32.mrf.mxu1 }
 0x31f   : > { %v887_v13 = vadd.f32 %v886_v11, %v3857_v10 }
 0x320   : > { %v888_v14 = vpop.f32.mrf.mxu1 }
 0x321   : > { %v917_v16 = vmax.f32 %v887_v13, 0.0 }
 0x322   : > { %v889_v37 = vpop.f32.mrf.mxu1 }
 0x323   : > { %v890_v38 = vadd.f32 %v889_v37, %v3835_v4  ;;  %v925_v42 = vadd.f32 %v917_v16, %v3740_v6 }
 0x324   : > { %v891_v43 = vpop.f32.mrf.mxu1 }
 0x325   : > { %v918_v45 = vmax.f32 %v890_v38, 0.0  ;;  %933 = vadd.xlane.f32.xlu1 %v925_v42 }
 0x326   : > { %v894_v19 = vpop.f32.mrf.mxu1 }
 0x327   : > { %v895_v49 = vadd.f32 %v894_v19, %v3855_v9  ;;  %v926_v20 = vadd.f32 %v918_v45, %v3736_v61 }
 0x328   : > { %v896_v21 = vpop.f32.mrf.mxu1 }
 0x329   : > { %v919_v22 = vmax.f32 %v895_v49, 0.0  ;;  %935 = vadd.xlane.f32.xlu0 %v926_v20 }
 0x32a   : > { %v897_v23 = vpop.f32.mrf.mxu1 }
 0x32b   : > { %v898_v50 = vadd.f32 %v897_v23, %v3833_v26  ;;  %v927_v8 = vadd.f32 %v919_v22, %v3760_v40  ;;  %v4793_v26 = vmov 0  }
 0x32c   : > { %v899_v53 = vpop.f32.mrf.mxu1 }
 0x32d   : > { %v920_v54 = vmax.f32 %v898_v50, 0.0  ;;  %937 = vadd.xlane.f32.xlu1 %v927_v8 }
 0x32e   : > { %v902_v6 = vpop.f32.mrf.mxu1 }
 0x32f   : > { %v903_v55 = vadd.f32 %v902_v6, %v3829_v25  ;;  %v928_v60 = vadd.f32 %v920_v54, %v3754_v35 }
 0x330   : > { %v904_v62 = vpop.f32.mrf.mxu1 }
 0x331   : > { %v921_v63 = vmax.f32 %v903_v55, 0.0  ;;  %939 = vadd.xlane.f32.xlu0 %v928_v60 }
 0x332   : > { %v905_v61 = vpop.f32.mrf.mxu1 }
 0x333   : > { %v906_v11 = vadd.f32 %v905_v61, %v3831_v12  ;;  %v929_v13 = vadd.f32 %v921_v63, %v3732_v57  ;;  %v3875_v57 = vpop.permute.xlu0 %2920 }
 0x334   : > { %v907_v14 = vpop.f32.mrf.mxu1 }
 0x335   : > { %v922_v16 = vmax.f32 %v906_v11, 0.0  ;;  %941 = vadd.xlane.f32.xlu0 %v929_v13 }
 0x336   : > { %v910_v40 = vpop.f32.mrf.mxu1 }
 0x337   : > { %v911_v37 = vadd.f32 %v910_v40, %v3827_v24  ;;  %v930_v38 = vadd.f32 %v922_v16, %v3734_v59 }
 0x338   : > { %v912_v43 = vpop.f32.mrf.mxu1 }
 0x339   : > { %v923_v45 = vmax.f32 %v911_v37, 0.0  ;;  %943 = vadd.xlane.f32.xlu0 %v930_v38 }
 0x33a   : > { %v913_v35 = vpop.f32.mrf.mxu1 }
 0x33b   : > { %v931_v19 = vadd.f32 %v923_v45, %v3749_v18  ;;  %v914_v59 = vadd.f32 %v913_v35, %v3853_v7 }
 0x33c   : > { %v915_v49 = vpop.f32.mrf.mxu1 }
 0x33d   : > { %945 = vadd.xlane.f32.xlu0 %v931_v19  ;;  %v924_v18 = vmax.f32 %v914_v59, 0.0 }
 0x33e   : > { %2940 = vrot.lane.b32.xlu1 %v3837_v27, %s3347_s18 }
 0x33f   : > { %v932_v23 = vadd.f32 %v924_v18, %v3751_v28 }
 0x353   : > { %2935 = vrot.lane.b32.xlu0 %v3539_v17, %s3350_s27  ;;  %s2743_s27 = smul.u32 80, %s380_s25 }
 0x355   : > { %s4694_s28 = scalar_lea.vmem [#allocation7], %s2743_s27  ;;  %s3278_s27 = scalar_lea.vmem %s3277_s11, 2560 }
 0x357   : > { %2945 = vrot.lane.b32.xlu0 %v3875_v57, %s3347_s18 }
 0x35b   : > { %2955 = vrot.lane.b32.xlu0 %v3848_v56, %s3347_s18 }
 0x362   : > { %947 = vadd.xlane.f32.xlu1 %v932_v23 }
 0x373   : > { %2950 = vrot.lane.b32.xlu1 %v3843_v52, %s3347_s18 }
 0x3ae   : > { %v934_v50 = vpop.xlane.xlu1 %933 }
 0x3af   : > { %v950_v53 = vmul.f32 0.0078125, %v934_v50 }
 0x3b1   : > { %v3889_v54 = vsub.f32 %v925_v42, %v950_v53 }
 0x3b2   : > { %v936_v17 = vpop.xlane.xlu0 %935 }
 0x3b3   : > { %v951_v6 = vmul.f32 0.0078125, %v936_v17  ;;  %v966_v55 = vmul.f32 %v3889_v54, %v3889_v54 }
 0x3b5   : > { %974 = vadd.xlane.f32.xlu1 %v966_v55  ;;  %v3893_v62 = vsub.f32 %v926_v20, %v951_v6 }
 0x3b6   : > { %v938_v63 = vpop.xlane.xlu1 %937 }
 0x3b7   : > { %v952_v61 = vmul.f32 0.0078125, %v938_v63  ;;  %v967_v28 = vmul.f32 %v3893_v62, %v3893_v62 }
 0x3b9   : > { %976 = vadd.xlane.f32.xlu1 %v967_v28  ;;  %v3897_v11 = vsub.f32 %v927_v8, %v952_v61 }
 0x3ba   : > { %v940_v14 = vpop.xlane.xlu0 %939  ;;  %v2941_v17 = vpop.permute.xlu1 %2940 }
 0x3bb   : > { %v953_v16 = vmul.f32 0.0078125, %v940_v14  ;;  %v968_v42 = vmul.f32 %v3897_v11, %v3897_v11  ;;  %v2943_v61 = vunpack.i.h.bf16 %v2941_v17  ;;  %v2942_v28 = vunpack.i.l.bf16 %v2941_v17 }
 0x3bd   : > { %978 = vadd.xlane.f32.xlu0 %v968_v42  ;;  %v3901_v40 = vsub.f32 %v928_v60, %v953_v16 }
 0x3be   : > { %v942_v37 = vpop.xlane.xlu0 %941 }
 0x3bf   : > { %v954_v43 = vmul.f32 0.0078125, %v942_v37  ;;  %v969_v20 = vmul.f32 %v3901_v40, %v3901_v40 }
 0x3c1   : > { %980 = vadd.xlane.f32.xlu1 %v969_v20  ;;  %v3905_v45 = vsub.f32 %v929_v13, %v954_v43 }
 0x3c2   : > { %v944_v35 = vpop.xlane.xlu0 %943 }
 0x3c3   : > { %v955_v49 = vmul.f32 0.0078125, %v944_v35  ;;  %v970_v8 = vmul.f32 %v3905_v45, %v3905_v45 }
 0x3c5   : > { %v3909_v59 = vsub.f32 %v930_v38, %v955_v49  ;;  %982 = vadd.xlane.f32.xlu1 %v970_v8 }
 0x3c6   : > { %v946_v18 = vpop.xlane.xlu0 %945 }
 0x3c7   : > { %v956_v50 = vmul.f32 0.0078125, %v946_v18  ;;  %v971_v60 = vmul.f32 %v3909_v59, %v3909_v59 }
 0x3c9   : > { %v3913_v53 = vsub.f32 %v931_v19, %v956_v50  ;;  %984 = vadd.xlane.f32.xlu1 %v971_v60  ;;  %v2497_v19 = vpack.c.bf16 %v2943_v61, %v2942_v28 }
 0x3ca   : > { %v2936_v6 = vpop.permute.xlu0 %2935 }
 0x3cb   : > { %v2938_v13 = vunpack.i.h.bf16 %v2936_v6  ;;  %v2937_v55 = vunpack.i.l.bf16 %v2936_v6  ;;  %v972_v63 = vmul.f32 %v3913_v53, %v3913_v53 }
 0x3cd   : > { %v1202_v38 = vpack.c.bf16 %v2938_v13, %v2937_v55  ;;  %986 = vadd.xlane.f32.xlu0 %v972_v63 }
 0x3ce   : > { %v2946_v14 = vpop.permute.xlu0 %2945 }
 0x3cf   : > { %1217 = vmatpush1.bf16.msra.mxu0 %v1202_v38  ;;  %v2948_v16 = vunpack.i.h.bf16 %v2946_v14  ;;  %v2947_v42 = vunpack.i.l.bf16 %v2946_v14 }
 0x3d0   : > { %1218 = vmatprep.subr.bf16.mxu0 %v4771_v0 }
 0x3d1   : > { %v2502_v37 = vpack.c.bf16 %v2948_v16, %v2947_v42 }
 0x3d2   : > { %v2956_v49 = vpop.permute.xlu0 %2955 }
 0x3d3   : > { %2498 = vmatpush1.bf16.msk.msra.mxu0 %vm3618_vm2, %v2497_v19  ;;  %v2958_v60 = vunpack.i.h.bf16 %v2956_v49  ;;  %v2957_v17 = vunpack.i.l.bf16 %v2956_v49 }
 0x3d4   : > { %1220 = vmatprep.subr.bf16.mxu0 %v4771_v0 }
 0x3d7   : > { %2503 = vmatpush1.bf16.msk.msra.mxu0 %vm3618_vm2, %v2502_v37 }
 0x3d8   : > { %1222 = vmatprep.subr.bf16.mxu0 %v4771_v0 }
 0x3e3   : > { %2965 = vrot.lane.b32.xlu0 %v3837_v27, %s3348_s20 }
 0x3e7   : > { %2970 = vrot.lane.b32.xlu0 %v3875_v57, %s3348_s20 }
 0x3eb   : > { %2975 = vrot.lane.b32.xlu0 %v3843_v52, %s3348_s20  ;;  %v948_v43 = vpop.xlane.xlu1 %947  ;;  %v2512_v52 = vpack.c.bf16 %v2958_v60, %v2957_v17 }
 0x3ec   : > { %v957_v20 = vmul.f32 0.0078125, %v948_v43 }
 0x3ee   : > { %v3930_v35 = vsub.f32 %v932_v23, %v957_v20  ;;  %v1082_v23 = vld [vmem:[%s4762_s5] sm:$0xff] }
 0x3ef   : > { %2980 = vrot.lane.b32.xlu0 %v3848_v56, %s3348_s20  ;;  %v2951_v8 = vpop.permute.xlu1 %2950  ;;  %v4769_v56 = vmov 0.0  }
 0x3f0   : > { %v2953_v18 = vunpack.i.h.bf16 %v2951_v8  ;;  %v2952_v50 = vunpack.i.l.bf16 %v2951_v8  ;;  %v973_v27 = vmul.f32 %v3930_v35, %v3930_v35  ;;  %2690 = vmatprep.subr.bf16.mxu1 %v4769_v56  ;;  %2698 = vmatprep.mubr.msk.bf16.mxu1 %vm3352_vm7, %v4769_v56 }
 0x3f2   : > { %v2507_v13 = vpack.c.bf16 %v2953_v18, %v2952_v50  ;;  %988 = vadd.xlane.f32.xlu1 %v973_v27 }
 0x3f3   : > { %2985 = vrot.lane.b32.xlu0 %v2936_v6, %s3348_s20 }
 0x3f4   : > { %2508 = vmatpush1.bf16.msk.msra.mxu0 %vm3618_vm2, %v2507_v13 }
 0x3f5   : > { %1224 = vmatprep.subr.bf16.mxu0 %v4771_v0 }
 0x3f8   : > { %2513 = vmatpush1.bf16.msk.msra.mxu0 %vm3618_vm2, %v2512_v52 }
 0x3f9   : > { %1226 = vmatprep.subr.bf16.mxu0 %v4771_v0 }
 0x403   : > { %2960 = vrot.lane.b32.xlu1 %v2936_v6, %s3347_s18 }
 0x407   : > { %1085 = vperm.xlu1 %2989, %v1082_v23  }
 0x43e   : > { %v975_v55 = vpop.xlane.xlu1 %974 }
 0x43f   : > { %v990_v17 = vmul.f32 0.0078125, %v975_v55 }
 0x442   : > { %v977_v63 = vpop.xlane.xlu1 %976 }
 0x443   : > { %v991_v43 = vmul.f32 0.0078125, %v977_v63  ;;  %v3968_v63 = vadd.f32 1e-05, %v990_v17 }
 0x445   : > { %v3957_v50 = vadd.f32 1e-05, %v991_v43 }
 0x446   : > { %v979_v38 = vpop.xlane.xlu0 %978 }
 0x447   : > { %v992_v8 = vmul.f32 0.0078125, %v979_v38  ;;  %vm1015_vm13 = vcmp.eq.f32.partialorder %v3957_v50, inf }
 0x449   : > { %v3962_v60 = vadd.f32 1e-05, %v992_v8 }
 0x44a   : > { %v981_v61 = vpop.xlane.xlu1 %980 }
 0x44b   : > { %v993_v49 = vmul.f32 0.0078125, %v981_v61  ;;  %vm1022_vm8 = vcmp.eq.f32.partialorder %v3962_v60, inf }
 0x44d   : > { %v3960_v27 = vadd.f32 1e-05, %v993_v49 }
 0x44e   : > { %v983_v28 = vpop.xlane.xlu1 %982 }
 0x44f   : > { %v994_v19 = vmul.f32 0.0078125, %v983_v28  ;;  %vm1029_vm9 = vcmp.eq.f32.partialorder %v3960_v27, inf }
 0x451   : > { %v3954_v18 = vadd.f32 1e-05, %v994_v19 }
 0x452   : > { %v985_v16 = vpop.xlane.xlu1 %984 }
 0x453   : > { %v995_v42 = vmul.f32 0.0078125, %v985_v16  ;;  %vm1036_vm10 = vcmp.eq.f32.partialorder %v3954_v18, inf  ;;  %vm1038_vm14 = vcmp.eq.f32.partialorder %v3954_v18, 0.0  ;;  %v1039_v22 = vand.u32 2147483648, %v3954_v18 }
 0x455   : > { %v3952_v20 = vadd.f32 1e-05, %v995_v42 }
 0x456   : > { %v987_v14 = vpop.xlane.xlu0 %986 }
 0x457   : > { %v996_v6 = vmul.f32 0.0078125, %v987_v14  ;;  %vm1043_vm11 = vcmp.eq.f32.partialorder %v3952_v20, inf  ;;  %vm1045_vm4 = vcmp.eq.f32.partialorder %v3952_v20, 0.0 }
 0x459   : > { %v3950_v37 = vadd.f32 1e-05, %v996_v6 }
 0x45a   : > { %v2966_v13 = vpop.permute.xlu0 %2965 }
 0x45b   : > { %3121 = vrsqrt.f32 %v3950_v37  ;;  %v2968_v6 = vunpack.i.h.bf16 %v2966_v13  ;;  %v2967_v42 = vunpack.i.l.bf16 %v2966_v13  ;;  %vm1050_vm12 = vcmp.eq.f32.partialorder %v3950_v37, inf }
 0x45c   : > { %3123 = vrsqrt.f32 %v3952_v20  ;;  %vm1052_vm15 = vcmp.eq.f32.partialorder %v3950_v37, 0.0 }
 0x45d   : > { %3125 = vrsqrt.f32 %v3954_v18 }
 0x45e   : > { %3127 = vrsqrt.f32 %v3957_v50  ;;  %v2971_v38 = vpop.permute.xlu0 %2970 }
 0x45f   : > { %3129 = vrsqrt.f32 %v3960_v27  ;;  %v2972_v56 = vunpack.i.l.bf16 %v2971_v38 }
 0x460   : > { %3131 = vrsqrt.f32 %v3962_v60 }
 0x462   : > { %v2976_v8 = vpop.permute.xlu0 %2975 }
 0x468   : > { %v3122_v16 = vpop.eup %3121 }
 0x469   : > { %v3124_v43 = vpop.eup %3123  ;;  %v1049_v49 = vmul.f32 %v3122_v16, %v3950_v37  ;;  %v2978_v16 = vunpack.i.h.bf16 %v2976_v8 }
 0x46a   : > { %v3126_v17 = vpop.eup %3125 }
 0x46b   : > { %v3128_v21 = vpop.eup %3127 }
 0x46c   : > { %v3130_v13 = vpop.eup %3129 }
 0x47b   : > { %v989_v52 = vpop.xlane.xlu1 %988 }
 0x47c   : > { %v997_v23 = vmul.f32 0.0078125, %v989_v52  ;;  %v1042_v52 = vmul.f32 %v3124_v43, %v3952_v20 }
 0x47e   : > { %v3970_v61 = vadd.f32 1e-05, %v997_v23  ;;  %v2522_v23 = vpack.c.bf16 %v2968_v6, %v2967_v42  ;;  %v2977_v6 = vunpack.i.l.bf16 %v2976_v8  ;;  %v1044_v42 = vsel %vm1043_vm11, %v3952_v20, %v1042_v52 }
 0x47f   : > { %v2961_v28 = vpop.permute.xlu1 %2960 }
 0x480   : > { %3133 = vrsqrt.f32 %v3970_v61  ;;  %v2963_v55 = vunpack.i.h.bf16 %v2961_v28  ;;  %v2962_v14 = vunpack.i.l.bf16 %v2961_v28  ;;  %v2973_v28 = vunpack.i.h.bf16 %v2971_v38 }
 0x481   : > { %3135 = vrsqrt.f32 %v3968_v63  ;;  %v1035_v38 = vmul.f32 %v3126_v17, %v3954_v18  ;;  %v1046_v17 = vand.u32 2147483648, %v3952_v20  ;;  %vm1057_vm11 = vcmp.eq.f32.partialorder %v3970_v61, inf }
 0x482   : > { %v2517_v19 = vpack.c.bf16 %v2963_v55, %v2962_v14  ;;  %v3132_v55 = vpop.eup %3131  ;;  %v1051_v14 = vsel %vm1050_vm12, %v3950_v37, %v1049_v49  ;;  %v2527_v43 = vpack.c.bf16 %v2973_v28, %v2972_v56  ;;  %v2981_v49 = vpop.permute.xlu0 %2980  ;;  %v1060_v20 = vand.u32 2147483648, %v3970_v61 }
 0x483   : > { %v1021_v4 = vmul.f32 %v3132_v55, %v3962_v60  ;;  %v1037_v56 = vsel %vm1036_vm10, %v3954_v18, %v1035_v38  ;;  %v1047_v28 = vsel %vm1045_vm4, %v1046_v17, %v1044_v42  ;;  %v2982_v7 = vunpack.i.l.bf16 %v2981_v49 }
 0x484   : > { %2518 = vmatpush1.bf16.msk.msra.mxu0 %vm3618_vm2, %v2517_v19  ;;  %v1053_v19 = vand.u32 2147483648, %v3950_v37  ;;  %vm1059_vm10 = vcmp.eq.f32.partialorder %v3970_v61, 0.0  ;;  %vm1024_vm12 = vcmp.eq.f32.partialorder %v3962_v60, 0.0  ;;  %vm3354_vm4 = vmmov 1  }
 0x485   : > { %1230 = vmatprep.subr.bf16.mxu0 %v4771_v0 }
 0x486   : > { %v1054_v52 = vsel %vm1052_vm15, %v1053_v19, %v1051_v14  ;;  %v2986_v14 = vpop.permute.xlu0 %2985  ;;  %vm1627_vm15 = vcmask 1043456  }
 0x487   : > { %3137 = vrcp.f32 %v1054_v52  ;;  %v2988_v18 = vunpack.i.h.bf16 %v2986_v14 }
 0x488   : > { %2523 = vmatpush2.bf16.msk.msra.mxu0 %vm3640_vm5, %v2522_v23  ;;  %v1028_v23 = vmul.f32 %v3130_v13, %v3960_v27  ;;  %v2532_v13 = vpack.c.bf16 %v2978_v16, %v2977_v6  ;;  %v1032_v16 = vand.u32 2147483648, %v3960_v27  ;;  %v1040_v6 = vsel %vm1038_vm14, %v1039_v22, %v1037_v56 }
 0x489   : > { %1232 = vmatprep.subr.bf16.mxu0 %v4771_v0  ;;  %v1014_v0 = vmul.f32 %v3128_v21, %v3957_v50  ;;  %v2983_v21 = vunpack.i.h.bf16 %v2981_v49  ;;  %3139 = vrcp.f32 %v1047_v28  ;;  %v2987_v22 = vunpack.i.l.bf16 %v2986_v14 }
 0x48a   : > { %v1030_v55 = vsel %vm1029_vm9, %v3960_v27, %v1028_v23  ;;  %vm1031_vm9 = vcmp.eq.f32.partialorder %v3960_v27, 0.0  ;;  %vm1008_vm14 = vcmp.eq.f32.partialorder %v3968_v63, inf  ;;  %v4795_v28 = vunpack.i.l.bf16 %v3875_v57 }
 0x48b   : > { %v2537_v23 = vpack.c.bf16 %v2983_v21, %v2982_v7  ;;  %v1016_v17 = vsel %vm1015_vm13, %v3957_v50, %v1014_v0  ;;  %v1011_v0 = vand.u32 2147483648, %v3968_v63  ;;  %vm1010_vm13 = vcmp.eq.f32.partialorder %v3968_v63, 0.0 }
 0x48c   : > { %2528 = vmatpush2.bf16.msk.msra.mxu0 %vm3640_vm5, %v2527_v43  ;;  %v1023_v43 = vsel %vm1022_vm8, %v3962_v60, %v1021_v4  ;;  %v1018_v4 = vand.u32 2147483648, %v3957_v50  ;;  %vm1017_vm8 = vcmp.eq.f32.partialorder %v3957_v50, 0.0 }
 0x48d   : > { %v3134_v8 = vpop.eup %3133  ;;  %1234 = vmatprep.subr.bf16.mxu0 %v4793_v26 }
 0x48e   : > { %v1056_v37 = vmul.f32 %v3134_v8, %v3970_v61  ;;  %v3136_v10 = vpop.eup %3135  ;;  %v1019_v49 = vsel %vm1017_vm8, %v1018_v4, %v1016_v17  ;;  %v2542_v8 = vpack.c.bf16 %v2988_v18, %v2987_v22 }
 0x48f   : > { %v1007_v19 = vmul.f32 %v3136_v10, %v3968_v63  ;;  %v4794_v10 = vand.u32 2147483648, %v3962_v60 }
 0x490   : > { %v1058_v38 = vsel %vm1057_vm11, %v3970_v61, %v1056_v37  ;;  %2533 = vmatpush2.bf16.msk.msra.mxu0 %vm3640_vm5, %v2532_v13  ;;  %v1033_v61 = vsel %vm1031_vm9, %v1032_v16, %v1030_v55  ;;  %vm2597_vm11 = vmpackc.low %vm3354_vm4, %vm2669_vm1 }
 0x491   : > { %v1061_v42 = vsel %vm1059_vm10, %v1060_v20, %v1058_v38  ;;  %1236 = vmatprep.subr.bf16.mxu0 %v4793_v26  ;;  %v1026_v27 = vsel %vm1024_vm12, %v4794_v10, %v1023_v43  ;;  %v1009_v7 = vsel %vm1008_vm14, %v3968_v63, %v1007_v19  ;;  %v4796_v63 = vunpack.i.h.bf16 %v3875_v57 }
 0x492   : > { %3141 = vrcp.f32 %v1061_v42  ;;  %v1012_v52 = vsel %vm1010_vm13, %v1011_v0, %v1009_v7 }
 0x493   : > { %3143 = vrcp.f32 %v1040_v6  ;;  %v1205_v13 = vpack.c.bf16 %v4796_v63, %v4795_v28  ;;  %v4797_v6 = vmov 0.0  }
 0x494   : > { %2538 = vmatpush2.bf16.msk.msra.mxu0 %vm3640_vm5, %v2537_v23  ;;  %3145 = vrcp.f32 %v1033_v61  ;;  %v3138_v60 = vpop.eup %3137  ;;  %v1086_v23 = vpop.permute.xlu1 %1085 }
 0x495   : > { %1238 = vmatprep.subr.bf16.mxu0 %v4793_v26  ;;  %3147 = vrcp.f32 %v1026_v27  ;;  %v1075_v37 = vmul.f32 %v3138_v60, %v3913_v53 }
 0x496   : > { %3149 = vrcp.f32 %v1019_v49  ;;  %v3140_v50 = vpop.eup %3139 }
 0x497   : > { %3151 = vrcp.f32 %v1012_v52  ;;  %v1073_v38 = vmul.f32 %v3140_v50, %v3909_v59 }
 0x498   : > { %2543 = vmatpush2.bf16.msk.msra.mxu0 %vm3640_vm5, %v2542_v8 }
 0x499   : > { %1240 = vmatprep.subr.bf16.mxu0 %v4793_v26 }
 0x49c   : > { %1241 = vmatpush2.bf16.msra.mxu0 %v3841_v15 }
 0x49d   : > { %1242 = vmatprep.subr.bf16.mxu0 %v4793_v26 }
 0x49f   : > { %v3142_v56 = vpop.eup %3141 }
 0x4a0   : > { %v1077_v21 = vmul.f32 %v3142_v56, %v3930_v35  ;;  %v3144_v20 = vpop.eup %3143  ;;  %1243 = vmatpush2.bf16.msra.mxu0 %v1205_v13 }
 0x4a1   : > { %v3146_v14 = vpop.eup %3145  ;;  %v1071_v15 = vmul.f32 %v3144_v20, %v3905_v45 }
 0x4a2   : > { %v1081_v55 = vpack.c.bf16 %v1077_v21, %v1075_v37  ;;  %v3148_v16 = vpop.eup %3147  ;;  %v1069_v53 = vmul.f32 %v3146_v14, %v3901_v40 }
 0x4a3   : > { %1245 = vmatmul.mubr.bf16.vlgmr.msra.gmra.mxu0 %v3667_v30  ;;  %v1080_v57 = vpack.c.bf16 %v1073_v38, %v1071_v15  ;;  %v3150_v35 = vpop.eup %3149  ;;  %v1067_v42 = vmul.f32 %v3148_v16, %v3897_v11  ;;  %v443_v11 = vld [vmem:[%s4761_s4] sm:$0xf] }
 0x4a4   : > { %2691 = vmatpush3.bf16.msra.mxu1 %v1081_v55  ;;  %2545 = vmatprep.mubr.msk.bf16.mxu0 %vm625_vm0, %v3672_v31  ;;  %v3152_v59 = vpop.eup %3151  ;;  %v1065_v19 = vmul.f32 %v3150_v35, %v3893_v62 }
 0x4a5   : > { %2692 = vmatprep.subr.bf16.mxu1 %v4797_v6  ;;  %v1079_v30 = vpack.c.bf16 %v1069_v53, %v1067_v42  ;;  %v1063_v45 = vmul.f32 %v3152_v59, %v3889_v54 }
 0x4a7   : > { %v1078_v31 = vpack.c.bf16 %v1065_v19, %v1063_v45  ;;  %v3100_v45 = vld [vmem:[%s4763_s6] sm:$0xff]  }
 0x4a8   : > { %2693 = vmatpush3.bf16.msra.mxu1 %v1080_v57 }
 0x4a9   : > { %2694 = vmatprep.subr.bf16.mxu1 %v4797_v6 }
 0x4ab   : > { %1253 = vmatmul.mubr.bf16.gmra.mxu0 %v3681_v1 }
 0x4ac   : > { %2695 = vmatpush3.bf16.msra.mxu1 %v1079_v30  ;;  %2546 = vmatprep.mubr.msk.bf16.mxu0 %vm625_vm0, %v3686_v2 }
 0x4ad   : > { %2696 = vmatprep.subr.bf16.mxu1 %v4797_v6 }
 0x4b0   : > { %2697 = vmatpush3.bf16.msra.mxu1 %v1078_v31  ;;  %v3353_v31 = vmov 2  }
 0x4b1   : > { %1345 = vmatprep.subr.bf16.mxu1 %v4793_v26  ;;  %3030 = vset.pattern.permute.xlu0 %v3353_v31 }
 0x4b2   : > { %3031 = vset.pattern.permute.xlu1 %v3353_v31 }
 0x4b3   : > { %2699 = vmatmul.mubr.msk.bf16.vlgmr.msra.gmra.mxu1 %vm839_vm6, %v443_v11  ;;  %1261 = vmatmul.mubr.bf16.gmra.mxu0 %v3694_v3  ;;  %v4145_v11 = vld [vmem:[%s4758_s1 + $0x30] sm:$0xff] }
 0x4b4   : > { %2588 = vmatprep.mubr.msk.bf16.mxu1 %vm839_vm6, %v3780_v47  ;;  %2547 = vmatprep.mubr.msk.bf16.mxu0 %vm625_vm0, %v3699_v5  ;;  %vm1614_vm0 = vcmask 195584  }
 0x4bb   : > { %1269 = vmatmul.mubr.bf16.gmra.mxu0 %v3707_v32 }
 0x4bc   : > { %2706 = vmatprep.mubr.msk.bf16.mxu0 %vm1614_vm0, %v3100_v45  ;;  %v3102_v45 = vld [vmem:[%s4763_s6 + $0x10] sm:$0xff]  }
 0x563   : > { %v1246_v1 = vpop.f32.mrf.mxu0 }
 0x564   : > { %v1247_v60 = vadd.f32 %v1246_v1, %v3727_v51  ;;  %v4151_v1 = vld [vmem:[%s4758_s1 + $0x38] sm:$0xff] }
 0x565   : > { %v1248_v2 = vpop.f32.mrf.mxu0 }
 0x566   : > { %v4090_v37 = vmax.f32 %v1247_v60, 0.0  ;;  %v4157_v2 = vld [vmem:[%s4758_s1 + $0x28] sm:$0xff] }
 0x567   : > { %v1249_v54 = vpop.f32.mrf.mxu0 }
 0x568   : > { %v1250_v0 = vadd.f32 %v1249_v54, %v3724_v48  ;;  %v4163_v54 = vld [vmem:[%s4758_s1 + $0x20] sm:$0xff] }
 0x569   : > { %v1251_v62 = vpop.f32.mrf.mxu0 }
 0x56a   : > { %v4086_v63 = vmax.f32 %v1250_v0, 0.0  ;;  %v4169_v62 = vld [vmem:[%s4758_s1 + $0x18] sm:$0xff] }
 0x56b   : > { %v1254_v40 = vpop.f32.mrf.mxu0 }
 0x56c   : > { %v3005_v20 = vpack.i.bf16 %v4086_v63, %v4090_v37  ;;  %v1255_v38 = vadd.f32 %v1254_v40, %v3722_v46  ;;  %v1337_v59 = vpack.c.bf16 %v4086_v63, %v4090_v37  ;;  %v4175_v40 = vld [vmem:[%s4758_s1 + $0x10] sm:$0xff] }
 0x56d   : > { %v1256_v43 = vpop.f32.mrf.mxu0 }
 0x56e   : > { %v4110_v57 = vmax.f32 %v1255_v38, 0.0  ;;  %v4181_v43 = vld [vmem:[%s4758_s1 + $0x8] sm:$0xff] }
 0x56f   : > { %v1257_v61 = vpop.f32.mrf.mxu0 }
 0x570   : > { %v1258_v51 = vadd.f32 %v1257_v61, %v3720_v44  ;;  %v4187_v61 = vld [vmem:[%s4758_s1] sm:$0xff] }
 0x571   : > { %v1259_v18 = vpop.f32.mrf.mxu0 }
 0x573   : > { %v1125_v22 = vpop.f32.mrf.mxu1  ;;  %v1262_v3 = vpop.f32.mrf.mxu0 }
 0x574   : > { %v1126_v17 = vadd.f32 %v1125_v22, %v1086_v23  ;;  %v1263_v27 = vadd.f32 %v1262_v3, %v3718_v41 }
 0x575   : > { %v2700_v4 = vpop.f32.mrf.mxu1  ;;  %v1264_v47 = vpop.f32.mrf.mxu0 }
 0x576   : > { %v1131_v10 = vmul.f32 -0.1, %v1126_v17  ;;  %v4082_v50 = vmax.f32 %v1263_v27, 0.0 }
 0x577   : > { %v1128_v5 = vpop.f32.mrf.mxu1  ;;  %v1265_v32 = vpop.f32.mrf.mxu0 }
 0x578   : > { %v1132_v7 = vmul.f32 1.442695, %v1131_v10  ;;  %v1266_v49 = vadd.f32 %v1265_v32, %v3716_v39 }
 0x579   : > { %v2701_v8 = vpop.f32.mrf.mxu1  ;;  %v1267_v52 = vpop.f32.mrf.mxu0 }
 0x57a   : > { %3153 = vpow2.f32 %v1132_v7  ;;  %v4084_v56 = vmax.f32 %v1266_v49, 0.0 }
 0x57b   : > { %v1270_v28 = vpop.f32.mrf.mxu0 }
 0x57c   : > { %v2995_v41 = vpack.i.bf16 %v4084_v56, %v4082_v50  ;;  %v1271_v39 = vadd.f32 %v1270_v28, %v3712_v33  ;;  %v4104_v33 = vmax.f32 %v1258_v51, 0.0  ;;  %v1339_v53 = vpack.c.bf16 %v4084_v56, %v4082_v50 }
 0x57d   : > { %v1272_v13 = vpop.f32.mrf.mxu0 }
 0x57e   : > { %2996 = vrot.lane.b32.xlu1 %v2995_v41, %s3347_s18  ;;  %v4099_v14 = vmax.f32 %v1271_v39, 0.0  ;;  %v3000_v35 = vpack.i.bf16 %v4104_v33, %v4110_v57  ;;  %v1338_v42 = vpack.c.bf16 %v4104_v33, %v4110_v57 }
 0x57f   : > { %v1273_v48 = vpop.f32.mrf.mxu0 }
 0x580   : > { %v1274_v21 = vadd.f32 %v1273_v48, %v3714_v36 }
 0x581   : > { %v1275_v55 = vpop.f32.mrf.mxu0 }
 0x582   : > { %v4101_v15 = vmax.f32 %v1274_v21, 0.0  ;;  %3006 = vrot.lane.b32.xlu1 %v3005_v20, %s3347_s18 }
 0x584   : > { %v2990_v16 = vpack.i.bf16 %v4101_v15, %v4099_v14  ;;  %v1340_v36 = vpack.c.bf16 %v4101_v15, %v4099_v14 }
 0x586   : > { %2991 = vrot.lane.b32.xlu0 %v2990_v16, %s3347_s18  ;;  %1346 = vmatpush1.bf16.msra.mxu1 %v1340_v36 }
 0x587   : > { %v3154_v44 = vpop.eup %3153  ;;  %3016 = vrot.lane.b32.xlu1 %v2995_v41, %s3348_s20  ;;  %1347 = vmatprep.subr.bf16.mxu1 %v4793_v26 }
 0x588   : > { %v1134_v46 = vadd.f32 1.0, %v3154_v44 }
 0x58a   : > { %3155 = vrcp.f32 %v1134_v46  ;;  %1348 = vmatpush1.bf16.msra.mxu1 %v1339_v53  ;;  %3001 = vrot.lane.b32.xlu0 %v3000_v35, %s3347_s18 }
 0x58b   : > { %1349 = vmatprep.subr.bf16.mxu1 %v4793_v26 }
 0x58e   : > { %3011 = vrot.lane.b32.xlu0 %v2990_v16, %s3348_s20  ;;  %1350 = vmatpush1.bf16.msra.mxu1 %v1338_v42 }
 0x58f   : > { %1351 = vmatprep.subr.bf16.mxu1 %v4793_v26 }
 0x592   : > { %3021 = vrot.lane.b32.xlu0 %v3000_v35, %s3348_s20  ;;  %1352 = vmatpush1.bf16.msra.mxu1 %v1337_v59 }
 0x593   : > { %1353 = vmatprep.subr.bf16.mxu1 %v4793_v26 }
 0x596   : > { %1311 = vrot.lane.b32.xlu0 %v4086_v63, %s3348_s20 }
 0x597   : > { %v4129_v30 = vpop.eup %3155 }
 0x598   : > { %v3025_v19 = vpack.i.bf16 %v4090_v37, %v4129_v30 }
 0x59a   : > { %3026 = vrot.lane.b32.xlu1 %v3025_v19, %s3348_s20  ;;  %1587 = vperm.xlu0 %3030, %v4145_v11  }
 0x59e   : > { %1554 = vrot.lane.b32.xlu1 %v4129_v30, %s3347_s18  ;;  %1583 = vperm.xlu0 %3030, %v4157_v2  }
 0x5a2   : > { %1591 = vperm.xlu1 %3031, %v4151_v1   ;;  %1575 = vperm.xlu0 %3030, %v4169_v62  }
 0x5a6   : > { %1579 = vperm.xlu1 %3031, %v4163_v54   ;;  %1567 = vperm.xlu0 %3030, %v4181_v43  }
 0x5aa   : > { %1571 = vperm.xlu1 %3031, %v4175_v40  }
 0x5ae   : > { %1563 = vperm.xlu1 %3031, %v4187_v61  }
 0x5f0   : > { %v2997_v23 = vpop.permute.xlu1 %2996 }
 0x5f1   : > { %v2999_v3 = vunpack.i.h.bf16 %v2997_v23  ;;  %v2998_v4 = vunpack.i.l.bf16 %v2997_v23  ;;  %v3213_v23 = vld [vmem:[#allocation2] ss:$8 sps:$4 sm:$0xff]  }
 0x5f3   : > { %v2556_v27 = vpack.c.bf16 %v2999_v3, %v2998_v4  ;;  %v3216_v3 = vld [vmem:[#allocation2 + $0x24] ss:$8 sps:$4 sm:$0xff]   ;;  %v3217_v4 = vld [vmem:[#allocation2 + $0x20] ss:$8 sps:$4 sm:$0xff]  }
 0x5f4   : > { %v3007_v32 = vpop.permute.xlu1 %3006 }
 0x5f5   : > { %v3009_v0 = vunpack.i.h.bf16 %v3007_v32  ;;  %v3008_v49 = vunpack.i.l.bf16 %v3007_v32 }
 0x5f7   : > { %v2566_v60 = vpack.c.bf16 %v3009_v0, %v3008_v49 }
 0x5f8   : > { %v2992_v18 = vpop.permute.xlu0 %2991 }
 0x5f9   : > { %v2994_v22 = vunpack.i.h.bf16 %v2992_v18  ;;  %v2993_v17 = vunpack.i.l.bf16 %v2992_v18  ;;  %v3017_v28 = vpop.permute.xlu1 %3016  ;;  %v3103_v18 = vld [vmem:[%s4763_s6 + $0x18] sm:$0xff]  }
 0x5fa   : > { %v3019_v39 = vunpack.i.h.bf16 %v3017_v28  ;;  %v3018_v48 = vunpack.i.l.bf16 %v3017_v28 }
 0x5fb   : > { %v2551_v10 = vpack.c.bf16 %v2994_v22, %v2993_v17  ;;  %v3214_v22 = vld [vmem:[#allocation2 + $0x14] ss:$8 sps:$4 sm:$0xff]   ;;  %v3215_v17 = vld [vmem:[#allocation2 + $0x10] ss:$8 sps:$4 sm:$0xff]  }
 0x5fc   : > { %v3002_v47 = vpop.permute.xlu0 %3001  ;;  %v2576_v16 = vpack.c.bf16 %v3019_v39, %v3018_v48 }
 0x5fd   : > { %2552 = vmatpush1.bf16.msk.msra.mxu1 %vm3618_vm2, %v2551_v10  ;;  %v3004_v5 = vunpack.i.h.bf16 %v3002_v47  ;;  %v3003_v7 = vunpack.i.l.bf16 %v3002_v47  ;;  %v3218_v10 = vld [vmem:[#allocation2 + $0x34] ss:$8 sps:$4 sm:$0xff]   ;;  %v3219_v47 = vld [vmem:[#allocation2 + $0x30] ss:$8 sps:$4 sm:$0xff]  }
 0x5fe   : > { %1355 = vmatprep.subr.bf16.mxu1 %v4793_v26 }
 0x5ff   : > { %v2561_v8 = vpack.c.bf16 %v3004_v5, %v3003_v7 }
 0x600   : > { %v3012_v52 = vpop.permute.xlu0 %3011 }
 0x601   : > { %2557 = vmatpush1.bf16.msk.msra.mxu1 %vm3618_vm2, %v2556_v27  ;;  %v3014_v41 = vunpack.i.h.bf16 %v3012_v52  ;;  %v3013_v13 = vunpack.i.l.bf16 %v3012_v52 }
 0x602   : > { %1357 = vmatprep.subr.bf16.mxu1 %v4793_v26 }
 0x603   : > { %v2571_v51 = vpack.c.bf16 %v3014_v41, %v3013_v13 }
 0x604   : > { %v3022_v20 = vpop.permute.xlu0 %3021 }
 0x605   : > { %2562 = vmatpush1.bf16.msk.msra.mxu1 %vm3618_vm2, %v2561_v8  ;;  %v3024_v36 = vunpack.i.h.bf16 %v3022_v20  ;;  %v3023_v44 = vunpack.i.l.bf16 %v3022_v20 }
 0x606   : > { %1359 = vmatprep.subr.bf16.mxu1 %v4793_v26 }
 0x607   : > { %v2581_v59 = vpack.c.bf16 %v3024_v36, %v3023_v44 }
 0x608   : > { %v1312_v29 = vpop.permute.xlu0 %1311 }
 0x609   : > { %2567 = vmatpush1.bf16.msk.msra.mxu1 %vm3618_vm2, %v2566_v60 }
 0x60a   : > { %1369 = vmatprep.subr.bf16.mxu1 %v4793_v26 }
 0x60c   : > { %v3027_v21 = vpop.permute.xlu1 %3026 }
 0x60d   : > { %v3028_v55 = vunpack.i.l.bf16 %v3027_v21  ;;  %2572 = vmatpush2.bf16.msk.msra.mxu1 %vm3640_vm5, %v2571_v51  ;;  %v3029_v19 = vunpack.i.h.bf16 %v3027_v21 }
 0x60e   : > { %1371 = vmatprep.subr.bf16.mxu1 %v4793_v26 }
 0x60f   : > { %v1559_v38 = vsel %vm503_vm3, 0.0, %v3028_v55  ;;  %v2586_v31 = vpack.c.bf16 %v1312_v29, %v3029_v19 }
 0x610   : > { %v1561_v46 = vpack.c.bf16 %v1559_v38, %v1559_v38  ;;  %v1555_v53 = vpop.permute.xlu1 %1554 }
 0x611   : > { %v2598_v35 = vpack.c.bf16 %v4129_v30, %v1555_v53  ;;  %2577 = vmatpush2.bf16.msk.msra.mxu1 %vm3640_vm5, %v2576_v16  ;;  %v3101_v30 = vld [vmem:[%s4763_s6 + $0x8] sm:$0xff]  }
 0x612   : > { %2742 = vmatprep.subr.msk.bf16.mxu0 %vm1627_vm15, %v1561_v46  ;;  %v1629_v42 = vsel %vm1627_vm15, %v1561_v46, 0  ;;  %1373 = vmatprep.subr.bf16.mxu1 %v4793_v26 }
 0x613   : > { %2703 = vmatpush3.bf16.msra.mxu0 %v1629_v42 }
 0x614   : > { %2704 = vmatprep.subr.msk.bf16.mxu0 %vm2597_vm11, %v2598_v35 }
 0x615   : > { %2582 = vmatpush2.bf16.msk.msra.mxu1 %vm3640_vm5, %v2581_v59  ;;  %v1588_v5 = vpop.permute.xlu0 %1587 }
 0x616   : > { %1375 = vmatprep.subr.bf16.mxu1 %v4793_v26 }
 0x617   : > { %2705 = vmatpush3.bf16.msk.msra.mxu0 %vm2597_vm11, %v2598_v35 }
 0x618   : > { %2714 = vmatprep.subr.bf16.mxu0 %v4797_v6 }
 0x619   : > { %2587 = vmatpush2.bf16.msk.msra.mxu1 %vm3640_vm5, %v2586_v31  ;;  %v1584_v60 = vpop.permute.xlu0 %1583 }
 0x61a   : > { %2707 = vmatmul.mubr.msk.bf16.vlgmr.msra.gmra.mxu0 %vm1614_vm0, %v3101_v30  ;;  %2004 = vmatprep.subr.bf16.mxu1 %v4793_v26 }
 0x61b   : > { %2710 = vmatprep.mubr.msk.bf16.mxu0 %vm1614_vm0, %v3102_v45 }
 0x61c   : > { %1378 = vmatmul.mubr.bf16.vlgmr.msra.gmra.mxu1 %v3213_v23 }
 0x61d   : > { %2589 = vmatprep.mubr.msk.bf16.mxu1 %vm839_vm6, %v3214_v22  ;;  %v1592_v32 = vpop.permute.xlu1 %1591  ;;  %v1576_v38 = vpop.permute.xlu0 %1575 }
 0x621   : > { %v1580_v13 = vpop.permute.xlu1 %1579  ;;  %v1568_v45 = vpop.permute.xlu0 %1567 }
 0x622   : > { %2711 = vmatmul.mubr.msk.bf16.gmra.mxu0 %vm1614_vm0, %v3103_v18 }
 0x623   : > { %2722 = vmatprep.mubr.msk.bf16.mxu0 %vm3352_vm7, %v4797_v6 }
 0x624   : > { %1386 = vmatmul.mubr.bf16.gmra.mxu1 %v3215_v17 }
 0x625   : > { %2590 = vmatprep.mubr.msk.bf16.mxu1 %vm839_vm6, %v3216_v3  ;;  %v1572_v46 = vpop.permute.xlu1 %1571 }
 0x629   : > { %v1564_v22 = vpop.permute.xlu1 %1563 }
 0x62c   : > { %1394 = vmatmul.mubr.bf16.gmra.mxu1 %v3217_v4 }
 0x62d   : > { %2591 = vmatprep.mubr.msk.bf16.mxu1 %vm839_vm6, %v3218_v10 }
 0x634   : > { %1402 = vmatmul.mubr.bf16.gmra.mxu1 %v3219_v47 }
 0x6da   : > { %v2708_v27 = vpop.f32.mrf.mxu0 }
 0x6db   : > { %v4259_v18 = vadd.f32 %v2708_v27, %v1572_v46 }
 0x6dc   : > { %v1665_v7 = vpop.f32.mrf.mxu0  ;;  %v1379_v0 = vpop.f32.mrf.mxu1 }
 0x6dd   : > { %v1698_v10 = vmax.f32 %v4259_v18, 0.0 }
 0x6de   : > { %v2709_v49 = vpop.f32.mrf.mxu0  ;;  %v1381_v8 = vpop.f32.mrf.mxu1 }
 0x6df   : > { %v4254_v29 = vadd.f32 %v2709_v49, %v1576_v38  ;;  %v4798_v38 = vld [vmem:[#allocation13_spill] sm:$0xff] }
 0x6e0   : > { %v1668_v52 = vpop.f32.mrf.mxu0  ;;  %v4237_v28 = vpop.f32.mrf.mxu1 }
 0x6e1   : > { %v1699_v17 = vmax.f32 %v4254_v29, 0.0  ;;  %v4264_v4 = vadd.f32 %v1668_v52, %v1568_v45 }
 0x6e2   : > { %v2712_v41 = vpop.f32.mrf.mxu0  ;;  %v1384_v39 = vpop.f32.mrf.mxu1 }
 0x6e3   : > { %v4239_v48 = vadd.f32 %v2712_v41, %v1588_v5  ;;  %v4269_v5 = vadd.f32 %v1665_v7, %v1564_v22  ;;  %v1697_v27 = vmax.f32 %v4264_v4, 0.0 }
 0x6e4   : > { %v1681_v51 = vpop.f32.mrf.mxu0  ;;  %v1387_v20 = vpop.f32.mrf.mxu1 }
 0x6e5   : > { %v1702_v21 = vmax.f32 %v4239_v48, 0.0  ;;  %v4249_v59 = vadd.f32 %v1681_v51, %v1580_v13  ;;  %v1696_v49 = vmax.f32 %v4269_v5, 0.0  ;;  %v1388_v13 = vadd.f32 %v1387_v20, %v3855_v9  ;;  %v4801_v20 = vld [vmem:[#allocation12_spill] sm:$0xff] }
 0x6e6   : > { %v2713_v55 = vpop.f32.mrf.mxu0  ;;  %v1389_v16 = vpop.f32.mrf.mxu1 }
 0x6e7   : > { %v4242_v36 = vadd.f32 %v2713_v55, %v1592_v32  ;;  %1716 = vadd.xlane.f32.xlu1 %v1702_v21  ;;  %v1700_v31 = vmax.f32 %v4249_v59, 0.0  ;;  %v1412_v45 = vmax.f32 %v1388_v13, 0.0 }
 0x6e8   : > { %v1684_v44 = vpop.f32.mrf.mxu0  ;;  %v1390_v35 = vpop.f32.mrf.mxu1 }
 0x6e9   : > { %v1703_v53 = vmax.f32 %v4242_v36, 0.0  ;;  %v4247_v42 = vadd.f32 %v1684_v44, %v1584_v60 }
 0x6ea   : > { %v1392_v30 = vpop.f32.mrf.mxu1 }
 0x6eb   : > { %v1701_v19 = vmax.f32 %v4247_v42, 0.0  ;;  %1718 = vadd.xlane.f32.xlu0 %v1703_v53 }
 0x6ec   : > { %v1395_v23 = vpop.f32.mrf.mxu1 }
 0x6ed   : > { %1714 = vadd.xlane.f32.xlu1 %v1701_v19  ;;  %v1396_v52 = vadd.f32 %v1395_v23, %v3829_v25  ;;  %v4800_v23 = vld [vmem:[#allocation11_spill] sm:$0xff] }
 0x6ee   : > { %v1397_v3 = vpop.f32.mrf.mxu1  ;;  %v1391_v22 = vadd.f32 %v1390_v35, %v4800_v23  ;;  %v4304_v35 = vadd.f32 %v1412_v45, %v4110_v57 }
 0x6ef   : > { %1712 = vadd.xlane.f32.xlu0 %v1700_v31  ;;  %v1414_v51 = vmax.f32 %v1396_v52, 0.0 }
 0x6f0   : > { %v1398_v47 = vpop.f32.mrf.mxu1 }
 0x6f1   : > { %1710 = vadd.xlane.f32.xlu1 %v1699_v17  ;;  %v1399_v55 = vadd.f32 %v1398_v47, %v3831_v12  ;;  %v4294_v12 = vadd.f32 %v1414_v51, %v4082_v50  ;;  %v1383_v47 = vadd.f32 %v4237_v28, %v4801_v20 }
 0x6f2   : > { %v1400_v32 = vpop.f32.mrf.mxu1 }
 0x6f3   : > { %1708 = vadd.xlane.f32.xlu0 %v1698_v10  ;;  %v1415_v3 = vmax.f32 %v1399_v55, 0.0  ;;  %v1413_v32 = vmax.f32 %v1391_v22, 0.0  ;;  %v1411_v50 = vmax.f32 %v1383_v47, 0.0 }
 0x6f4   : > { %v1403_v8 = vpop.f32.mrf.mxu1 }
 0x6f5   : > { %1706 = vadd.xlane.f32.xlu1 %v1697_v27  ;;  %v1404_v60 = vadd.f32 %v1403_v8, %v3827_v24  ;;  %v4799_v24 = vld [vmem:[#allocation14_spill] sm:$0xff] }
 0x6f6   : > { %v1405_v41 = vpop.f32.mrf.mxu1  ;;  %v1380_v30 = vadd.f32 %v1379_v0, %v4799_v24  ;;  %v4301_v0 = vadd.f32 %v1415_v3, %v4084_v56  ;;  %v4317_v56 = vadd.f32 %v1411_v50, %v4086_v63 }
 0x6f7   : > { %1704 = vadd.xlane.f32.xlu0 %v1696_v49  ;;  %v1416_v7 = vmax.f32 %v1404_v60, 0.0 }
 0x6f8   : > { %v1406_v39 = vpop.f32.mrf.mxu1 }
 0x6f9   : > { %v1407_v16 = vadd.f32 %v1406_v39, %v4798_v38  ;;  %v4285_v44 = vadd.f32 %v1416_v7, %v4099_v14  ;;  %v1410_v14 = vmax.f32 %v1380_v30, 0.0 }
 0x6fa   : > { %v1408_v46 = vpop.f32.mrf.mxu1 }
 0x6fb   : > { %v1417_v25 = vmax.f32 %v1407_v16, 0.0  ;;  %1438 = vadd.xlane.f32.xlu0 %v4285_v44  ;;  %v4312_v8 = vadd.f32 %v1410_v14, %v4090_v37 }
 0x6fd   : > { %v4291_v9 = vadd.f32 %v1417_v25, %v4101_v15  ;;  %v4309_v15 = vadd.f32 %v1413_v32, %v4104_v33 }
 0x6ff   : > { %1440 = vadd.xlane.f32.xlu1 %v4291_v9  ;;  %1434 = vadd.xlane.f32.xlu0 %v4294_v12 }
 0x703   : > { %1436 = vadd.xlane.f32.xlu1 %v4301_v0  ;;  %1430 = vadd.xlane.f32.xlu0 %v4304_v35 }
 0x707   : > { %1432 = vadd.xlane.f32.xlu1 %v4309_v15  ;;  %1426 = vadd.xlane.f32.xlu0 %v4312_v8 }
 0x70b   : > { %1428 = vadd.xlane.f32.xlu1 %v4317_v56 }
 0x770   : > { %v1717_v57 = vpop.xlane.xlu1 %1716 }
 0x771   : > { %v1726_v28 = vmul.f32 0.0078125, %v1717_v57 }
 0x773   : > { %v4322_v52 = vsub.f32 %v1702_v21, %v1726_v28 }
 0x774   : > { %v1719_v33 = vpop.xlane.xlu0 %1718 }
 0x775   : > { %v1727_v60 = vmul.f32 0.0078125, %v1719_v33  ;;  %v1742_v37 = vmul.f32 %v4322_v52, %v4322_v52 }
 0x776   : > { %v1715_v41 = vpop.xlane.xlu1 %1714 }
 0x777   : > { %v4328_v7 = vsub.f32 %v1703_v53, %v1727_v60  ;;  %v1725_v63 = vmul.f32 0.0078125, %v1715_v41  ;;  %1756 = vadd.xlane.f32.xlu0 %v1742_v37 }
 0x778   : > { %v1713_v13 = vpop.xlane.xlu0 %1712 }
 0x779   : > { %v4332_v39 = vsub.f32 %v1701_v19, %v1725_v63  ;;  %v1724_v48 = vmul.f32 0.0078125, %v1713_v13  ;;  %v1743_v21 = vmul.f32 %v4328_v7, %v4328_v7 }
 0x77a   : > { %v1711_v51 = vpop.xlane.xlu1 %1710 }
 0x77b   : > { %v4338_v55 = vsub.f32 %v1700_v31, %v1724_v48  ;;  %v1723_v38 = vmul.f32 0.0078125, %v1711_v51  ;;  %1758 = vadd.xlane.f32.xlu1 %v1743_v21  ;;  %v1741_v42 = vmul.f32 %v4332_v39, %v4332_v39 }
 0x77c   : > { %v1709_v36 = vpop.xlane.xlu0 %1708 }
 0x77d   : > { %v4342_v53 = vsub.f32 %v1699_v17, %v1723_v38  ;;  %v1722_v16 = vmul.f32 0.0078125, %v1709_v36  ;;  %v1740_v19 = vmul.f32 %v4338_v55, %v4338_v55 }
 0x77e   : > { %v1707_v46 = vpop.xlane.xlu1 %1706 }
 0x77f   : > { %v4350_v59 = vsub.f32 %v1698_v10, %v1722_v16  ;;  %v1721_v31 = vmul.f32 0.0078125, %v1707_v46  ;;  %1754 = vadd.xlane.f32.xlu1 %v1741_v42  ;;  %1752 = vadd.xlane.f32.xlu0 %v1740_v19  ;;  %v1739_v24 = vmul.f32 %v4342_v53, %v4342_v53 }
 0x780   : > { %v1705_v25 = vpop.xlane.xlu0 %1704 }
 0x781   : > { %v4354_v29 = vsub.f32 %v1697_v27, %v1721_v31  ;;  %v1720_v17 = vmul.f32 0.0078125, %v1705_v25  ;;  %v1738_v30 = vmul.f32 %v4350_v59, %v4350_v59 }
 0x783   : > { %v4362_v18 = vsub.f32 %v1696_v49, %v1720_v17  ;;  %1750 = vadd.xlane.f32.xlu1 %v1739_v24  ;;  %1748 = vadd.xlane.f32.xlu0 %v1738_v30  ;;  %v1737_v45 = vmul.f32 %v4354_v29, %v4354_v29 }
 0x784   : > { %v1439_v10 = vpop.xlane.xlu0 %1438 }
 0x785   : > { %v1736_v4 = vmul.f32 %v4362_v18, %v4362_v18  ;;  %v4368_v27 = vmul.f32 0.0078125, %v1439_v10 }
 0x787   : > { %1746 = vadd.xlane.f32.xlu1 %v1737_v45  ;;  %1744 = vadd.xlane.f32.xlu0 %v1736_v4  ;;  %v1456_v23 = vsub.f32 %v4285_v44, %v4368_v27 }
 0x788   : > { %v1441_v22 = vpop.xlane.xlu1 %1440  ;;  %v1435_v5 = vpop.xlane.xlu0 %1434 }
 0x789   : > { %v1464_v49 = vmul.f32 %v1456_v23, %v1456_v23  ;;  %v4372_v3 = vmul.f32 0.0078125, %v1441_v22  ;;  %v4374_v14 = vmul.f32 0.0078125, %v1435_v5 }
 0x78b   : > { %v1457_v20 = vsub.f32 %v4291_v9, %v4372_v3  ;;  %v1454_v47 = vsub.f32 %v4294_v12, %v4374_v14  ;;  %1478 = vadd.xlane.f32.xlu0 %v1464_v49 }
 0x78c   : > { %v1437_v32 = vpop.xlane.xlu1 %1436  ;;  %v1431_v50 = vpop.xlane.xlu0 %1430 }
 0x78d   : > { %v1465_v57 = vmul.f32 %v1457_v20, %v1457_v20  ;;  %v1462_v28 = vmul.f32 %v1454_v47, %v1454_v47  ;;  %v4380_v33 = vmul.f32 0.0078125, %v1437_v32  ;;  %v4382_v44 = vmul.f32 0.0078125, %v1431_v50 }
 0x78f   : > { %v1455_v60 = vsub.f32 %v4301_v0, %v4380_v33  ;;  %v1452_v37 = vsub.f32 %v4304_v35, %v4382_v44  ;;  %1480 = vadd.xlane.f32.xlu1 %v1465_v57  ;;  %1474 = vadd.xlane.f32.xlu0 %v1462_v28 }
 0x790   : > { %v1433_v9 = vpop.xlane.xlu1 %1432  ;;  %v1427_v41 = vpop.xlane.xlu0 %1426 }
 0x791   : > { %v1463_v12 = vmul.f32 %v1455_v60, %v1455_v60  ;;  %v1460_v63 = vmul.f32 %v1452_v37, %v1452_v37  ;;  %v4388_v13 = vmul.f32 0.0078125, %v1433_v9  ;;  %v4390_v48 = vmul.f32 0.0078125, %v1427_v41 }
 0x793   : > { %v1453_v21 = vsub.f32 %v4309_v15, %v4388_v13  ;;  %v1450_v51 = vsub.f32 %v4312_v8, %v4390_v48  ;;  %1476 = vadd.xlane.f32.xlu1 %v1463_v12  ;;  %1470 = vadd.xlane.f32.xlu0 %v1460_v63 }
 0x794   : > { %v1429_v0 = vpop.xlane.xlu1 %1428 }
 0x795   : > { %v1461_v35 = vmul.f32 %v1453_v21, %v1453_v21  ;;  %v1458_v38 = vmul.f32 %v1450_v51, %v1450_v51  ;;  %v4396_v36 = vmul.f32 0.0078125, %v1429_v0 }
 0x797   : > { %v1451_v16 = vsub.f32 %v4317_v56, %v4396_v36  ;;  %1472 = vadd.xlane.f32.xlu1 %v1461_v35  ;;  %1466 = vadd.xlane.f32.xlu0 %v1458_v38 }
 0x799   : > { %v1459_v42 = vmul.f32 %v1451_v16, %v1451_v16 }
 0x79b   : > { %1468 = vadd.xlane.f32.xlu1 %v1459_v42 }
 0x800   : > { %v1757_v19 = vpop.xlane.xlu0 %1756 }
 0x801   : > { %v1766_v46 = vmul.f32 0.0078125, %v1757_v19 }
 0x803   : > { %v1774_v15 = vadd.f32 1e-05, %v1766_v46 }
 0x804   : > { %v1759_v31 = vpop.xlane.xlu1 %1758 }
 0x805   : > { %3157 = vrsqrt.f32 %v1774_v15  ;;  %v1767_v8 = vmul.f32 0.0078125, %v1759_v31  ;;  %vm1820_vm1 = vcmp.eq.f32.partialorder %v1774_v15, inf  ;;  %vm1822_vm3 = vcmp.eq.f32.partialorder %v1774_v15, 0.0 }
 0x806   : > { %v1823_v51 = vand.u32 2147483648, %v1774_v15 }
 0x807   : > { %v1775_v25 = vadd.f32 1e-05, %v1767_v8 }
 0x808   : > { %v1755_v17 = vpop.xlane.xlu1 %1754  ;;  %v1753_v24 = vpop.xlane.xlu0 %1752 }
 0x809   : > { %v1765_v30 = vmul.f32 0.0078125, %v1755_v17  ;;  %v1764_v10 = vmul.f32 0.0078125, %v1753_v24  ;;  %3159 = vrsqrt.f32 %v1775_v25  ;;  %vm1827_vm10 = vcmp.eq.f32.partialorder %v1775_v25, inf }
 0x80a   : > { %vm1829_vm9 = vcmp.eq.f32.partialorder %v1775_v25, 0.0  ;;  %v1830_v35 = vand.u32 2147483648, %v1775_v25 }
 0x80b   : > { %v1773_v45 = vadd.f32 1e-05, %v1765_v30  ;;  %v4400_v4 = vadd.f32 1e-05, %v1764_v10 }
 0x80c   : > { %v1751_v56 = vpop.xlane.xlu1 %1750  ;;  %v1749_v23 = vpop.xlane.xlu0 %1748 }
 0x80d   : > { %3161 = vrsqrt.f32 %v1773_v45  ;;  %v1763_v22 = vmul.f32 0.0078125, %v1751_v56  ;;  %v1762_v5 = vmul.f32 0.0078125, %v1749_v23  ;;  %vm1813_vm12 = vcmp.eq.f32.partialorder %v1773_v45, inf }
 0x80e   : > { %3163 = vrsqrt.f32 %v4400_v4  ;;  %vm1815_vm14 = vcmp.eq.f32.partialorder %v1773_v45, 0.0  ;;  %v1816_v8 = vand.u32 2147483648, %v1773_v45  ;;  %vm1806_vm8 = vcmp.eq.f32.partialorder %v4400_v4, inf }
 0x80f   : > { %v4403_v47 = vadd.f32 1e-05, %v1763_v22  ;;  %v4405_v32 = vadd.f32 1e-05, %v1762_v5  ;;  %vm1808_vm13 = vcmp.eq.f32.partialorder %v4400_v4, 0.0  ;;  %v1809_v23 = vand.u32 2147483648, %v4400_v4 }
 0x810   : > { %v1747_v49 = vpop.xlane.xlu1 %1746  ;;  %v1745_v20 = vpop.xlane.xlu0 %1744 }
 0x811   : > { %v1761_v50 = vmul.f32 0.0078125, %v1747_v49  ;;  %v1760_v57 = vmul.f32 0.0078125, %v1745_v20  ;;  %3165 = vrsqrt.f32 %v4403_v47  ;;  %vm1799_vm0 = vcmp.eq.f32.partialorder %v4403_v47, inf }
 0x812   : > { %v3158_v28 = vpop.eup %3157  ;;  %3167 = vrsqrt.f32 %v4405_v32  ;;  %vm1801_vm15 = vcmp.eq.f32.partialorder %v4403_v47, 0.0  ;;  %vm1792_vm4 = vcmp.eq.f32.partialorder %v4405_v32, inf  ;;  %vm1794_vm11 = vcmp.eq.f32.partialorder %v4405_v32, 0.0 }
 0x813   : > { %v1819_v60 = vmul.f32 %v3158_v28, %v1774_v15  ;;  %v4409_v37 = vadd.f32 1e-05, %v1761_v50  ;;  %v4411_v9 = vadd.f32 1e-05, %v1760_v57 }
 0x814   : > { %v1479_v41 = vpop.xlane.xlu0 %1478 }
 0x815   : > { %v1821_v12 = vsel %vm1820_vm1, %v1774_v15, %v1819_v60  ;;  %v1488_v63 = vmul.f32 0.0078125, %v1479_v41  ;;  %3169 = vrsqrt.f32 %v4409_v37  ;;  %vm1785_vm1 = vcmp.eq.f32.partialorder %v4409_v37, inf }
 0x816   : > { %v3160_v21 = vpop.eup %3159  ;;  %v1824_v38 = vsel %vm1822_vm3, %v1823_v51, %v1821_v12  ;;  %3171 = vrsqrt.f32 %v4411_v9  ;;  %v1802_v51 = vand.u32 2147483648, %v4403_v47  ;;  %vm1787_vm3 = vcmp.eq.f32.partialorder %v4409_v37, 0.0 }
 0x817   : > { %v1826_v0 = vmul.f32 %v3160_v21, %v1775_v25  ;;  %v4415_v16 = vadd.f32 1e-05, %v1488_v63 }
 0x818   : > { %v1481_v42 = vpop.xlane.xlu1 %1480  ;;  %v1475_v19 = vpop.xlane.xlu0 %1474 }
 0x819   : > { %v1828_v31 = vsel %vm1827_vm10, %v1775_v25, %v1826_v0  ;;  %v1489_v17 = vmul.f32 0.0078125, %v1481_v42  ;;  %v1486_v15 = vmul.f32 0.0078125, %v1475_v19  ;;  %3173 = vrsqrt.f32 %v4415_v16 }
 0x81a   : > { %v3162_v46 = vpop.eup %3161  ;;  %v1831_v30 = vsel %vm1829_vm9, %v1830_v35, %v1828_v31  ;;  %3175 = vrcp.f32 %v1824_v38  ;;  %v1795_v19 = vand.u32 2147483648, %v4405_v32  ;;  %vm1778_vm10 = vcmp.eq.f32.partialorder %v4411_v9, inf }
 0x81b   : > { %v3164_v24 = vpop.eup %3163  ;;  %v1812_v10 = vmul.f32 %v3162_v46, %v1773_v45  ;;  %3177 = vrcp.f32 %v1831_v30  ;;  %v4424_v5 = vadd.f32 1e-05, %v1489_v17  ;;  %v4426_v49 = vadd.f32 1e-05, %v1486_v15 }
 0x81c   : > { %v1805_v56 = vmul.f32 %v3164_v24, %v4400_v4  ;;  %v1477_v25 = vpop.xlane.xlu1 %1476  ;;  %v1471_v20 = vpop.xlane.xlu0 %1470  ;;  %vm1780_vm9 = vcmp.eq.f32.partialorder %v4411_v9, 0.0 }
 0x81d   : > { %v1814_v22 = vsel %vm1813_vm12, %v1773_v45, %v1812_v10  ;;  %v1487_v28 = vmul.f32 0.0078125, %v1477_v25  ;;  %v1484_v60 = vmul.f32 0.0078125, %v1471_v20  ;;  %vm1542_vm12 = vcmp.eq.f32.partialorder %v4415_v16, inf }
 0x81e   : > { %v1817_v50 = vsel %vm1815_vm14, %v1816_v8, %v1814_v22  ;;  %v1807_v57 = vsel %vm1806_vm8, %v4400_v4, %v1805_v56  ;;  %v3166_v12 = vpop.eup %3165  ;;  %vm1544_vm14 = vcmp.eq.f32.partialorder %v4415_v16, 0.0  ;;  %vm1549_vm8 = vcmp.eq.f32.partialorder %v4424_v5, inf }
 0x81f   : > { %3179 = vrcp.f32 %v1817_v50  ;;  %v1810_v41 = vsel %vm1808_vm13, %v1809_v23, %v1807_v57  ;;  %v3168_v63 = vpop.eup %3167  ;;  %v1798_v21 = vmul.f32 %v3166_v12, %v4403_v47  ;;  %v4435_v45 = vadd.f32 1e-05, %v1487_v28 }
 0x820   : > { %3181 = vrcp.f32 %v1810_v41  ;;  %v1473_v4 = vpop.xlane.xlu1 %1472  ;;  %v1791_v0 = vmul.f32 %v3168_v63, %v4405_v32  ;;  %v4439_v35 = vadd.f32 1e-05, %v1484_v60  ;;  %v1467_v8 = vpop.xlane.xlu0 %1466  ;;  %v1781_v50 = vand.u32 2147483648, %v4411_v9 }
 0x821   : > { %3183 = vrsqrt.f32 %v4424_v5  ;;  %v1485_v38 = vmul.f32 0.0078125, %v1473_v4  ;;  %v1800_v42 = vsel %vm1799_vm0, %v4403_v47, %v1798_v21  ;;  %v1788_v47 = vand.u32 2147483648, %v4409_v37 }
 0x822   : > { %3185 = vrsqrt.f32 %v4426_v49  ;;  %v1803_v46 = vsel %vm1801_vm15, %v1802_v51, %v1800_v42  ;;  %v1793_v31 = vsel %vm1792_vm4, %v4405_v32, %v1791_v0  ;;  %v3170_v17 = vpop.eup %3169  ;;  %v1482_v23 = vmul.f32 0.0078125, %v1467_v8 }
 0x823   : > { %3187 = vrsqrt.f32 %v4435_v45  ;;  %v1796_v15 = vsel %vm1794_vm11, %v1795_v19, %v1793_v31  ;;  %v3172_v30 = vpop.eup %3171  ;;  %v1784_v10 = vmul.f32 %v3170_v17, %v4409_v37  ;;  %v4453_v56 = vadd.f32 1e-05, %v1485_v38 }
 0x824   : > { %3189 = vrsqrt.f32 %v4439_v35  ;;  %v1469_v24 = vpop.xlane.xlu1 %1468  ;;  %v1777_v32 = vmul.f32 %v3172_v30, %v4411_v9  ;;  %v4465_v21 = vadd.f32 1e-05, %v1482_v23  ;;  %vm1551_vm13 = vcmp.eq.f32.partialorder %v4424_v5, 0.0 }
 0x825   : > { %3191 = vrcp.f32 %v1796_v15  ;;  %v1483_v22 = vmul.f32 0.0078125, %v1469_v24  ;;  %v1786_v20 = vsel %vm1785_vm1, %v4409_v37, %v1784_v10  ;;  %v1545_v37 = vand.u32 2147483648, %v4415_v16 }
 0x826   : > { %3193 = vrcp.f32 %v1803_v46  ;;  %v3174_v25 = vpop.eup %3173  ;;  %v1789_v28 = vsel %vm1787_vm3, %v1788_v47, %v1786_v20  ;;  %v1779_v60 = vsel %vm1778_vm10, %v4411_v9, %v1777_v32  ;;  %v1552_v38 = vand.u32 2147483648, %v4424_v5 }
 0x827   : > { %3195 = vrsqrt.f32 %v4453_v56  ;;  %v3176_v57 = vpop.eup %3175  ;;  %v1541_v41 = vmul.f32 %v3174_v25, %v4415_v16  ;;  %v1782_v63 = vsel %vm1780_vm9, %v1781_v50, %v1779_v60  ;;  %v4467_v51 = vadd.f32 1e-05, %v1483_v22 }
 0x828   : > { %v3178_v12 = vpop.eup %3177  ;;  %3197 = vrcp.f32 %v1789_v28  ;;  %vm1528_vm0 = vcmp.eq.f32.partialorder %v4426_v49, inf  ;;  %vm1530_vm15 = vcmp.eq.f32.partialorder %v4426_v49, 0.0  ;;  %v1531_v19 = vand.u32 2147483648, %v4426_v49 }
 0x829   : > { %3199 = vrcp.f32 %v1782_v63  ;;  %v1543_v4 = vsel %vm1542_vm12, %v4415_v16, %v1541_v41  ;;  %vm1535_vm4 = vcmp.eq.f32.partialorder %v4435_v45, inf  ;;  %vm1537_vm11 = vcmp.eq.f32.partialorder %v4435_v45, 0.0 }
 0x82a   : > { %3201 = vrsqrt.f32 %v4465_v21  ;;  %v1546_v16 = vsel %vm1544_vm14, %v1545_v37, %v1543_v4  ;;  %v1538_v8 = vand.u32 2147483648, %v4435_v45  ;;  %v1845_v17 = vmul.f32 %v3176_v57, %v4322_v52 }
 0x82b   : > { %3203 = vrsqrt.f32 %v4467_v51  ;;  %vm1514_vm1 = vcmp.eq.f32.partialorder %v4439_v35, inf  ;;  %vm1516_vm3 = vcmp.eq.f32.partialorder %v4439_v35, 0.0  ;;  %v1847_v23 = vmul.f32 %v3178_v12, %v4328_v7 }
 0x82c   : > { %v3180_v0 = vpop.eup %3179  ;;  %v1854_v22 = vmul.f32 %v1845_v17, %v1546_v16  ;;  %v1517_v20 = vand.u32 2147483648, %v4439_v35  ;;  %vm1521_vm10 = vcmp.eq.f32.partialorder %v4453_v56, inf  ;;  %vm1523_vm9 = vcmp.eq.f32.partialorder %v4453_v56, 0.0 }
 0x82d   : > { %v3182_v9 = vpop.eup %3181  ;;  %v1843_v60 = vmul.f32 %v3180_v0, %v4332_v39  ;;  %vm1500_vm12 = vcmp.eq.f32.partialorder %v4465_v21, inf  ;;  %vm1502_vm14 = vcmp.eq.f32.partialorder %v4465_v21, 0.0 }
 0x82e   : > { %v3184_v42 = vpop.eup %3183  ;;  %v1841_v24 = vmul.f32 %v3182_v9, %v4338_v55  ;;  %v4514_v9 = vadd.f32 %v1854_v22, %v4368_v27 }
 0x82f   : > { %v3186_v46 = vpop.eup %3185  ;;  %v1548_v31 = vmul.f32 %v3184_v42, %v4424_v5 }
 0x830   : > { %v3188_v15 = vpop.eup %3187  ;;  %v1527_v47 = vmul.f32 %v3186_v46, %v4426_v49 }
 0x831   : > { %v3190_v30 = vpop.eup %3189  ;;  %v1550_v10 = vsel %vm1549_vm8, %v4424_v5, %v1548_v31  ;;  %v1534_v32 = vmul.f32 %v3188_v15, %v4435_v45  ;;  %vm1507_vm8 = vcmp.eq.f32.partialorder %v4467_v51, inf }
 0x832   : > { %v1529_v52 = vsel %vm1528_vm0, %v4426_v49, %v1527_v47  ;;  %v1513_v25 = vmul.f32 %v3190_v30, %v4439_v35  ;;  %v1553_v55 = vsel %vm1551_vm13, %v1552_v38, %v1550_v10  ;;  %v3192_v50 = vpop.eup %3191  ;;  %vm1509_vm13 = vcmp.eq.f32.partialorder %v4467_v51, 0.0 }
 0x833   : > { %v1536_v57 = vsel %vm1535_vm4, %v4435_v45, %v1534_v32  ;;  %v1855_v28 = vmul.f32 %v1847_v23, %v1553_v55  ;;  %v1532_v7 = vsel %vm1530_vm15, %v1531_v19, %v1529_v52  ;;  %v3194_v41 = vpop.eup %3193  ;;  %v1837_v4 = vmul.f32 %v3192_v50, %v4350_v59 }
 0x834   : > { %v1515_v12 = vsel %vm1514_vm1, %v4439_v35, %v1513_v25  ;;  %v1539_v5 = vsel %vm1537_vm11, %v1538_v8, %v1536_v57  ;;  %v1852_v63 = vmul.f32 %v1841_v24, %v1532_v7  ;;  %v3196_v37 = vpop.eup %3195  ;;  %v1524_v45 = vand.u32 2147483648, %v4453_v56 }
 0x835   : > { %v4517_v49 = vadd.f32 %v1855_v28, %v4372_v3  ;;  %v1853_v38 = vmul.f32 %v1843_v60, %v1539_v5  ;;  %v1518_v39 = vsel %vm1516_vm3, %v1517_v20, %v1515_v12  ;;  %v1520_v0 = vmul.f32 %v3196_v37, %v4453_v56  ;;  %v3198_v42 = vpop.eup %3197 }
 0x836   : > { %v4529_v3 = vadd.f32 %v1852_v63, %v4374_v14  ;;  %v3200_v35 = vpop.eup %3199  ;;  %v1839_v46 = vmul.f32 %v3194_v41, %v4342_v53  ;;  %v1850_v31 = vmul.f32 %v1837_v4, %v1518_v39  ;;  %v1503_v24 = vand.u32 2147483648, %v4465_v21 }
 0x837   : > { %v3032_v59 = vpack.i.bf16 %v4517_v49, %v4514_v9  ;;  %v1919_v27 = vpack.c.bf16 %v4517_v49, %v4514_v9  ;;  %v4532_v19 = vadd.f32 %v1853_v38, %v4380_v33  ;;  %v1522_v16 = vsel %vm1521_vm10, %v4453_v56, %v1520_v0  ;;  %v3202_v8 = vpop.eup %3201 }
 0x838   : > { %v1525_v33 = vsel %vm1523_vm9, %v1524_v45, %v1522_v16  ;;  %v3204_v15 = vpop.eup %3203  ;;  %v1499_v47 = vmul.f32 %v3202_v8, %v4465_v21  ;;  %v1833_v56 = vmul.f32 %v3200_v35, %v4362_v18  ;;  %v1510_v32 = vand.u32 2147483648, %v4467_v51 }
 0x839   : > { %3033 = vrot.lane.b32.xlu0 %v3032_v59, %s3347_s18  ;;  %2005 = vmatpush1.bf16.msra.mxu1 %v1919_v27  ;;  %v3037_v17 = vpack.i.bf16 %v4532_v19, %v4529_v3  ;;  %v1918_v14 = vpack.c.bf16 %v4532_v19, %v4529_v3  ;;  %v1851_v53 = vmul.f32 %v1839_v46, %v1525_v33  ;;  %v3104_v33 = vld [vmem:[#allocation5] ss:$8 sps:$4 sm:$0xff]  }
 0x83a   : > { %2006 = vmatprep.subr.bf16.mxu1 %v4793_v26  ;;  %v1506_v30 = vmul.f32 %v3204_v15, %v4467_v51  ;;  %v1501_v10 = vsel %vm1500_vm12, %v4465_v21, %v1499_v47  ;;  %v4554_v23 = vadd.f32 %v1850_v31, %v4382_v44  ;;  %v1835_v25 = vmul.f32 %v3198_v42, %v4354_v29  ;;  %v3107_v15 = vld [vmem:[#allocation5 + $0x14] ss:$8 sps:$4 sm:$0xff]   ;;  %v3109_v47 = vld [vmem:[#allocation5 + $0x10] ss:$8 sps:$4 sm:$0xff]  }
 0x83b   : > { %3038 = vrot.lane.b32.xlu1 %v3037_v17, %s3347_s18  ;;  %v4557_v22 = vadd.f32 %v1851_v53, %v4388_v13  ;;  %v1504_v52 = vsel %vm1502_vm14, %v1503_v24, %v1501_v10  ;;  %v3110_v53 = vld [vmem:[#allocation5 + $0x24] ss:$8 sps:$4 sm:$0xff]   ;;  %v3113_v24 = vld [vmem:[#allocation5 + $0x34] ss:$8 sps:$4 sm:$0xff]  }
 0x83c   : > { %v1508_v18 = vsel %vm1507_vm8, %v4467_v51, %v1506_v30  ;;  %v1848_v55 = vmul.f32 %v1833_v56, %v1504_v52  ;;  %v3112_v56 = vld [vmem:[#allocation5 + $0x20] ss:$8 sps:$4 sm:$0xff]   ;;  %v2091_v10 = vld [vmem:[%s4766_s9 + $0x10] sm:$0xff] }
 0x83d   : > { %2007 = vmatpush1.bf16.msra.mxu1 %v1918_v14  ;;  %v3042_v21 = vpack.i.bf16 %v4557_v22, %v4554_v23  ;;  %v1917_v44 = vpack.c.bf16 %v4557_v22, %v4554_v23  ;;  %v1511_v20 = vsel %vm1509_vm13, %v1510_v32, %v1508_v18  ;;  %v2089_v30 = vld [vmem:[%s4766_s9] sm:$0xff]  ;;  %v2092_v32 = vld [vmem:[%s4766_s9 + $0x18] sm:$0xff]  ;;  %v2094_v52 = vld [vmem:[%s4766_s9 + $0x28] sm:$0xff] }
 0x83e   : > { %2008 = vmatprep.subr.bf16.mxu1 %v4793_v26  ;;  %v1849_v13 = vmul.f32 %v1835_v25, %v1511_v20  ;;  %v4569_v51 = vadd.f32 %v1848_v55, %v4390_v48  ;;  %v3106_v48 = vld [vmem:[#allocation5 + $0x4] ss:$8 sps:$4 sm:$0xff]   ;;  %v2095_v25 = vld [vmem:[%s4766_s9 + $0x30] sm:$0xff] }
 0x83f   : > { %3043 = vrot.lane.b32.xlu1 %v3042_v21, %s3347_s18  ;;  %2652 = vmatprep.mubr.msk.bf16.mxu1 %vm839_vm6, %v3106_v48  ;;  %v2093_v18 = vld [vmem:[%s4766_s9 + $0x20] sm:$0xff]  ;;  %v2098_v20 = vld [vmem:[%s4766_s9 + $0x48] sm:$0xff] }
 0x840   : > { %v4572_v50 = vadd.f32 %v1849_v13, %v4396_v36  ;;  %v3355_v36 = vmov 3  }
 0x841   : > { %2009 = vmatpush1.bf16.msra.mxu1 %v1917_v44  ;;  %3072 = vset.pattern.permute.xlu1 %v3355_v36  ;;  %v2097_v44 = vld [vmem:[%s4766_s9 + $0x40] sm:$0xff] }
 0x842   : > { %2010 = vmatprep.subr.bf16.mxu1 %v4793_v26  ;;  %v3047_v29 = vpack.i.bf16 %v4572_v50, %v4569_v51  ;;  %v1916_v57 = vpack.c.bf16 %v4572_v50, %v4569_v51  ;;  %3073 = vset.pattern.permute.xlu0 %v3355_v36 }
 0x843   : > { %3053 = vrot.lane.b32.xlu1 %v3032_v59, %s3348_s20 }
 0x844   : > { %3048 = vrot.lane.b32.xlu0 %v3047_v29, %s3347_s18  ;;  %s2745_s18 = smul.u32 1280, %s3435_s17  ;;  %s4717_s17 = scalar_lea.sflag [#allocation4], %s380_s25 }
 0x845   : > { %2011 = vmatpush1.bf16.msra.mxu1 %v1916_v57 }
 0x846   : > { %2012 = vmatprep.subr.bf16.mxu1 %v4793_v26  ;;  %s4712_s21 = scalar_lea.hbm %s4767_s10, %s2745_s18 }
 0x847   : > { %3063 = vrot.lane.b32.xlu1 %v3042_v21, %s3348_s20  ;;  %v2096_v21 = vld [vmem:[%s4766_s9 + $0x38] sm:$0xff] }
 0x848   : > { %3058 = vrot.lane.b32.xlu0 %v3037_v17, %s3348_s20 }
 0x84b   : > { %1949 = vperm.xlu1 %3072, %v4145_v11  }
 0x84c   : > { %3068 = vrot.lane.b32.xlu0 %v3047_v29, %s3348_s20  ;;  %s2286_s20 = sshll.u32 %s4694_s28, 4  ;;  %s4707_s20 = int_to_ptr.vmem [resolvable:$true] %s2286_s20 }
 0x84d   : > { %s3272_s26 = scalar_lea.vmem %s4707_s20, 1280  ;;  %p3279_p11 = scmp.lt.s32.totalorder %s4707_s20, %s3277_s11 }
 0x84e   : > { %p3273_p10 = scmp.ne.s32.totalorder %s4707_s20, %s3272_s26  ;;  %p3280_p0 = scmp.lt.s32.totalorder %s3278_s27, %s3272_s26 }
 0x84f   : > { %1941 = vperm.xlu1 %3072, %v4163_v54  }
 0x850   : > { %1953 = vperm.xlu0 %3073, %v4151_v1   ;;  %p3274_p12 = pnand %p3273_p10, %p3452_p5  ;;  %p3281_p1 = por %p3280_p0, %p3279_p11 }
 0x852   : > { %p3275_p8 = pneg %p3274_p12 }
 0x853   : > { %1945 = vperm.xlu1 %3072, %v4157_v2  }
 0x854   : > { %1933 = vperm.xlu0 %3073, %v4175_v40   ;;  %p3282_p3 = pnand %p3281_p1, %p3275_p8 }
 0x857   : > { %1937 = vperm.xlu1 %3072, %v4169_v62  }
 0x858   : > { %1925 = vperm.xlu0 %3073, %v4187_v61  }
 0x85b   : > { %1929 = vperm.xlu1 %3072, %v4181_v43  }
 0x85c   : > { %3074 = vset.pattern.permute.xlu0 %v4793_v26 }
 0x85d   : > { %2101 = vperm.xlu0 %3074, %v2089_v30  }
 0x85f   : > { %3075 = vset.pattern.permute.xlu1 %v4793_v26 }
 0x860   : > { %2106 = vperm.xlu1 %3075, %v2090_v58  }
 0x861   : > { %2116 = vperm.xlu0 %3074, %v2092_v32   ;;  %v3120_v32 = vld [vmem:[%s4765_s8 + $0x20] sm:$0xff]  }
 0x864   : > { %2111 = vperm.xlu1 %3075, %v2091_v10  }
 0x865   : > { %2126 = vperm.xlu0 %3074, %v2094_v52  }
 0x868   : > { %2121 = vperm.xlu1 %3075, %v2093_v18  }
 0x869   : > { %2136 = vperm.xlu0 %3074, %v2096_v21  }
 0x86c   : > { %2131 = vperm.xlu1 %3075, %v2095_v25  }
 0x86d   : > { %2146 = vperm.xlu0 %3074, %v2098_v20  }
 0x870   : > { %2141 = vperm.xlu1 %3075, %v2097_v44  }
 0x8ab   : > { %v3034_v28 = vpop.permute.xlu0 %3033 }
 0x8ac   : > { %v3036_v11 = vunpack.i.h.bf16 %v3034_v28  ;;  %v3035_v7 = vunpack.i.l.bf16 %v3034_v28 }
 0x8ad   : > { %v3039_v1 = vpop.permute.xlu1 %3038 }
 0x8ae   : > { %v2615_v60 = vpack.c.bf16 %v3036_v11, %v3035_v7  ;;  %v3041_v54 = vunpack.i.h.bf16 %v3039_v1  ;;  %v3040_v41 = vunpack.i.l.bf16 %v3039_v1 }
 0x8b0   : > { %v2620_v40 = vpack.c.bf16 %v3041_v54, %v3040_v41  ;;  %2616 = vmatpush1.bf16.msk.msra.mxu1 %vm3618_vm2, %v2615_v60 }
 0x8b1   : > { %2014 = vmatprep.subr.bf16.mxu1 %v4793_v26  ;;  %v3044_v2 = vpop.permute.xlu1 %3043 }
 0x8b2   : > { %v3046_v62 = vunpack.i.h.bf16 %v3044_v2  ;;  %v3045_v61 = vunpack.i.l.bf16 %v3044_v2 }
 0x8b4   : > { %2621 = vmatpush1.bf16.msk.msra.mxu1 %vm3618_vm2, %v2620_v40  ;;  %v2625_v43 = vpack.c.bf16 %v3046_v62, %v3045_v61 }
 0x8b5   : > { %2016 = vmatprep.subr.bf16.mxu1 %v4793_v26  ;;  %v3054_v12 = vpop.permute.xlu1 %3053 }
 0x8b6   : > { %v3049_v5 = vpop.permute.xlu0 %3048  ;;  %v3056_v37 = vunpack.i.h.bf16 %v3054_v12  ;;  %v3055_v38 = vunpack.i.l.bf16 %v3054_v12 }
 0x8b7   : > { %v3051_v63 = vunpack.i.h.bf16 %v3049_v5  ;;  %v3050_v4 = vunpack.i.l.bf16 %v3049_v5 }
 0x8b8   : > { %2626 = vmatpush1.bf16.msk.msra.mxu1 %vm3618_vm2, %v2625_v43  ;;  %v2635_v45 = vpack.c.bf16 %v3056_v37, %v3055_v38 }
 0x8b9   : > { %2018 = vmatprep.subr.bf16.mxu1 %v4793_v26  ;;  %v2630_v39 = vpack.c.bf16 %v3051_v63, %v3050_v4  ;;  %v3064_v27 = vpop.permute.xlu1 %3063 }
 0x8ba   : > { %v3059_v0 = vpop.permute.xlu0 %3058  ;;  %v3066_v35 = vunpack.i.h.bf16 %v3064_v27  ;;  %v3065_v16 = vunpack.i.l.bf16 %v3064_v27 }
 0x8bb   : > { %v3061_v42 = vunpack.i.h.bf16 %v3059_v0  ;;  %v3060_v59 = vunpack.i.l.bf16 %v3059_v0 }
 0x8bc   : > { %2631 = vmatpush1.bf16.msk.msra.mxu1 %vm3618_vm2, %v2630_v39  ;;  %v2645_v34 = vpack.c.bf16 %v3066_v35, %v3065_v16 }
 0x8bd   : > { %2028 = vmatprep.subr.bf16.mxu1 %v4793_v26  ;;  %v2640_v46 = vpack.c.bf16 %v3061_v42, %v3060_v59 }
 0x8be   : > { %v3069_v31 = vpop.permute.xlu0 %3068 }
 0x8bf   : > { %v3071_v8 = vunpack.i.h.bf16 %v3069_v31  ;;  %v3070_v17 = vunpack.i.l.bf16 %v3069_v31 }
 0x8c0   : > { %2636 = vmatpush2.bf16.msk.msra.mxu1 %vm3640_vm5, %v2635_v45 }
 0x8c1   : > { %2030 = vmatprep.subr.bf16.mxu1 %v4793_v26  ;;  %v2650_v14 = vpack.c.bf16 %v3071_v8, %v3070_v17 }
 0x8c4   : > { %2641 = vmatpush2.bf16.msk.msra.mxu1 %vm3640_vm5, %v2640_v46 }
 0x8c5   : > { %2032 = vmatprep.subr.bf16.mxu1 %v4793_v26 }
 0x8c6   : > { %v1950_v48 = vpop.permute.xlu1 %1949 }
 0x8c8   : > { %2646 = vmatpush2.bf16.msk.msra.mxu1 %vm3640_vm5, %v2645_v34 }
 0x8c9   : > { %2034 = vmatprep.subr.bf16.mxu1 %v4793_v26  ;;  %v3115_v26 = vld [vmem:[#allocation5 + $0x30] ss:$8 sps:$4 sm:$0xff]  }
 0x8ca   : > { %v1942_v7 = vpop.permute.xlu1 %1941 }
 0x8cb   : > { %v1954_v2 = vpop.permute.xlu0 %1953 }
 0x8cc   : > { %2651 = vmatpush2.bf16.msk.msra.mxu1 %vm3640_vm5, %v2650_v14 }
 0x8ce   : > { %v1946_v41 = vpop.permute.xlu1 %1945 }
 0x8cf   : > { %2037 = vmatmul.mubr.bf16.vlgmr.msra.gmra.mxu1 %v3104_v33  ;;  %v1934_v4 = vpop.permute.xlu0 %1933 }
 0x8d0   : > { %2653 = vmatprep.mubr.msk.bf16.mxu1 %vm839_vm6, %v3107_v15 }
 0x8d2   : > { %v1938_v12 = vpop.permute.xlu1 %1937 }
 0x8d3   : > { %v1926_v8 = vpop.permute.xlu0 %1925 }
 0x8d6   : > { %v1930_v35 = vpop.permute.xlu1 %1929 }
 0x8d7   : > { %2045 = vmatmul.mubr.bf16.gmra.mxu1 %v3109_v47 }
 0x8d8   : > { %2654 = vmatprep.mubr.msk.bf16.mxu1 %vm839_vm6, %v3110_v53  ;;  %v2102_v18 = vpop.permute.xlu0 %2101 }
 0x8db   : > { %v2107_v25 = vpop.permute.xlu1 %2106 }
 0x8df   : > { %2053 = vmatmul.mubr.bf16.gmra.mxu1 %v3112_v56 }
 0x8e0   : > { %2655 = vmatprep.mubr.msk.bf16.mxu1 %vm839_vm6, %v3113_v24 }
 0x8e7   : > { %2061 = vmatmul.mubr.bf16.gmra.mxu1 %v3115_v26 }
 0x98f   : > { %v2038_v55 = vpop.f32.mrf.mxu1 }
 0x990   : > { %v2039_v47 = vadd.f32 %v2038_v55, %v1926_v8 }
 0x991   : > { %v2040_v13 = vpop.f32.mrf.mxu1 }
 0x992   : > { %v2112_v13 = vpop.permute.xlu1 %2111 }
 0x993   : > { %v2041_v29 = vpop.f32.mrf.mxu1 }
 0x994   : > { %v2042_v17 = vadd.f32 %v2041_v29, %v1930_v35 }
 0x995   : > { %v2043_v57 = vpop.f32.mrf.mxu1 }
 0x996   : > { %v2070_v24 = vmax.f32 %v2042_v17, 0.0 }
 0x997   : > { %v2046_v36 = vpop.f32.mrf.mxu1 }
 0x998   : > { %v2047_v16 = vadd.f32 %v2046_v36, %v1934_v4 }
 0x999   : > { %v2048_v28 = vpop.f32.mrf.mxu1 }
 0x99a   : > { %v2071_v53 = vmax.f32 %v2047_v16, 0.0  ;;  %v2117_v28 = vpop.permute.xlu0 %2116 }
 0x99b   : > { %v2049_v11 = vpop.f32.mrf.mxu1 }
 0x99c   : > { %v2050_v42 = vadd.f32 %v2049_v11, %v1938_v12 }
 0x99d   : > { %v2051_v1 = vpop.f32.mrf.mxu1 }
 0x99e   : > { %v2072_v14 = vmax.f32 %v2050_v42, 0.0 }
 0x99f   : > { %v2054_v60 = vpop.f32.mrf.mxu1 }
 0x9a0   : > { %v2055_v38 = vadd.f32 %v2054_v60, %v1942_v7  ;;  %v2080_v26 = vadd.f32 %v2072_v14, %v4557_v22  ;;  %v3116_v22 = vld [vmem:[%s4765_s8] sm:$0xff]   ;;  %v2122_v60 = vpop.permute.xlu1 %2121 }
 0x9a1   : > { %v2056_v54 = vpop.f32.mrf.mxu1 }
 0x9a2   : > { %v2073_v46 = vmax.f32 %v2055_v38, 0.0 }
 0x9a3   : > { %v2057_v40 = vpop.f32.mrf.mxu1 }
 0x9a4   : > { %v2058_v63 = vadd.f32 %v2057_v40, %v1946_v41  ;;  %v2081_v56 = vadd.f32 %v2073_v46, %v4529_v3  ;;  %v2132_v12 = vpop.permute.xlu1 %2131 }
 0x9a5   : > { %v2059_v62 = vpop.f32.mrf.mxu1 }
 0x9a6   : > { %v2074_v59 = vmax.f32 %v2058_v63, 0.0 }
 0x9a7   : > { %v2062_v61 = vpop.f32.mrf.mxu1 }
 0x9a8   : > { %v2063_v43 = vadd.f32 %v2062_v61, %v1950_v48  ;;  %v2082_v33 = vadd.f32 %v2074_v59, %v4532_v19  ;;  %v2078_v19 = vadd.f32 %v2070_v24, %v4572_v50  ;;  %v3119_v50 = vld [vmem:[%s4765_s8 + $0x18] sm:$0xff]  }
 0x9a9   : > { %v2064_v5 = vpop.f32.mrf.mxu1 }
 0x9aa   : > { %v2075_v39 = vmax.f32 %v2063_v43, 0.0  ;;  %v2087_v58 = vpack.c.bf16 %v2082_v33, %v2081_v56 }
 0x9ab   : > { %v2065_v37 = vpop.f32.mrf.mxu1 }
 0x9ac   : > { %v2066_v0 = vadd.f32 %v2065_v37, %v1954_v2  ;;  %v2083_v31 = vadd.f32 %v2075_v39, %v4514_v9  ;;  %v2069_v9 = vmax.f32 %v2039_v47, 0.0  ;;  %v2127_v2 = vpop.permute.xlu0 %2126 }
 0x9ad   : > { %v2067_v45 = vpop.f32.mrf.mxu1 }
 0x9ae   : > { %v2076_v27 = vmax.f32 %v2066_v0, 0.0  ;;  %v2077_v10 = vadd.f32 %v2069_v9, %v4569_v51  ;;  %v3118_v51 = vld [vmem:[%s4765_s8 + $0x10] sm:$0xff]   ;;  %v2142_v45 = vpop.permute.xlu1 %2141 }
 0x9b0   : > { %v2084_v34 = vadd.f32 %v2076_v27, %v4517_v49  ;;  %v2079_v49 = vadd.f32 %v2071_v53, %v4554_v23  ;;  %v2085_v3 = vpack.c.bf16 %v2078_v19, %v2077_v10  ;;  %v3117_v23 = vld [vmem:[%s4765_s8 + $0x8] sm:$0xff]   ;;  %v2137_v37 = vpop.permute.xlu0 %2136 }
 0x9b2   : > { %v2088_v15 = vpack.c.bf16 %v2084_v34, %v2083_v31  ;;  %v2086_v30 = vpack.c.bf16 %v2080_v26, %v2079_v49 }
 0x9b4   : > { %2715 = vmatpush3.bf16.msra.mxu0 %v2088_v15  ;;  %v2147_v27 = vpop.permute.xlu0 %2146 }
 0x9b5   : > { %2716 = vmatprep.subr.bf16.mxu0 %v4797_v6 }
 0x9b8   : > { %2717 = vmatpush3.bf16.msra.mxu0 %v2087_v58 }
 0x9b9   : > { %2718 = vmatprep.subr.bf16.mxu0 %v4797_v6 }
 0x9bc   : > { %2719 = vmatpush3.bf16.msra.mxu0 %v2086_v30 }
 0x9bd   : > { %2720 = vmatprep.subr.bf16.mxu0 %v4797_v6 }
 0x9c0   : > { %2721 = vmatpush3.bf16.msra.mxu0 %v2085_v3 }
 0x9c3   : > { %2723 = vmatmul.mubr.msk.bf16.vlgmr.msra.gmra.mxu0 %vm839_vm6, %v3116_v22 }
 0x9c4   : > { %2726 = vmatprep.mubr.msk.bf16.mxu0 %vm3352_vm7, %v4797_v6 }
 0x9cb   : > { %2727 = vmatmul.mubr.msk.bf16.gmra.mxu0 %vm839_vm6, %v3117_v23 }
 0x9cc   : > { %2730 = vmatprep.mubr.msk.bf16.mxu0 %vm3352_vm7, %v4797_v6 }
 0x9d3   : > { %2731 = vmatmul.mubr.msk.bf16.gmra.mxu0 %vm839_vm6, %v3118_v51 }
 0x9d4   : > { %2734 = vmatprep.mubr.msk.bf16.mxu0 %vm3352_vm7, %v4797_v6 }
 0x9db   : > { %2735 = vmatmul.mubr.msk.bf16.gmra.mxu0 %vm839_vm6, %v3119_v50 }
 0x9dc   : > { %2738 = vmatprep.mubr.msk.bf16.mxu0 %vm3352_vm7, %v4797_v6 }
 0x9e3   : > { %2739 = vmatmul.mubr.msk.bf16.gmra.mxu0 %vm839_vm6, %v3120_v32 }
 0xa83   : > { %v2223_v52 = vpop.f32.mrf.mxu0 }
 0xa84   : > { %v2224_v21 = vadd.f32 %v2223_v52, %v2102_v18 }
 0xa85   : > { %v2724_v44 = vpop.f32.mrf.mxu0 }
 0xa86   : > { %2262 = vst [vmem:[%s4694_s28] sm:$0xff] %v2224_v21 }
 0xa87   : > { %v2226_v6 = vpop.f32.mrf.mxu0 }
 0xa88   : > { %v2227_v20 = vadd.f32 %v2226_v6, %v2107_v25 }
 0xa89   : > { %v2725_v55 = vpop.f32.mrf.mxu0 }
 0xa8a   : > { %2263 = vst [vmem:[%s4694_s28 + $0x8] sm:$0xff] %v2227_v20 }
 0xa8b   : > { %v2231_v29 = vpop.f32.mrf.mxu0 }
 0xa8c   : > { %v2232_v57 = vadd.f32 %v2231_v29, %v2112_v13 }
 0xa8d   : > { %v2728_v48 = vpop.f32.mrf.mxu0 }
 0xa8e   : > { %2264 = vst [vmem:[%s4694_s28 + $0x10] sm:$0xff] %v2232_v57 }
 0xa8f   : > { %v2234_v36 = vpop.f32.mrf.mxu0 }
 0xa90   : > { %v2235_v11 = vadd.f32 %v2234_v36, %v2117_v28 }
 0xa91   : > { %v2729_v7 = vpop.f32.mrf.mxu0 }
 0xa92   : > { %2265 = vst [vmem:[%s4694_s28 + $0x18] sm:$0xff] %v2235_v11 }
 0xa93   : > { %v2239_v1 = vpop.f32.mrf.mxu0 }
 0xa94   : > { %v2240_v54 = vadd.f32 %v2239_v1, %v2122_v60 }
 0xa95   : > { %v2732_v41 = vpop.f32.mrf.mxu0 }
 0xa96   : > { %2266 = vst [vmem:[%s4694_s28 + $0x20] sm:$0xff] %v2240_v54 }
 0xa97   : > { %v2242_v40 = vpop.f32.mrf.mxu0 }
 0xa98   : > { %v2243_v62 = vadd.f32 %v2242_v40, %v2127_v2 }
 0xa99   : > { %v2733_v61 = vpop.f32.mrf.mxu0 }
 0xa9a   : > { %2267 = vst [vmem:[%s4694_s28 + $0x28] sm:$0xff] %v2243_v62 }
 0xa9b   : > { %v2247_v43 = vpop.f32.mrf.mxu0 }
 0xa9c   : > { %v2248_v5 = vadd.f32 %v2247_v43, %v2132_v12 }
 0xa9d   : > { %v2736_v63 = vpop.f32.mrf.mxu0 }
 0xa9e   : > { %2268 = vst [vmem:[%s4694_s28 + $0x30] sm:$0xff] %v2248_v5 }
 0xa9f   : > { %v2250_v4 = vpop.f32.mrf.mxu0 }
 0xaa0   : > { %v2251_v38 = vadd.f32 %v2250_v4, %v2137_v37 }
 0xaa1   : > { %v2737_v39 = vpop.f32.mrf.mxu0 }
 0xaa2   : > { %2269 = vst [vmem:[%s4694_s28 + $0x38] sm:$0xff] %v2251_v38 }
 0xaa3   : > { %v2255_v0 = vpop.f32.mrf.mxu0 }
 0xaa4   : > { %v2256_v42 = vadd.f32 %v2255_v0, %v2142_v45 }
 0xaa5   : > { %v2740_v59 = vpop.f32.mrf.mxu0 }
 0xaa6   : > { %2270 = vst [vmem:[%s4694_s28 + $0x40] sm:$0xff] %v2256_v42 }
 0xaa7   : > { %v2258_v35 = vpop.f32.mrf.mxu0 }
 0xaa8   : > { %v2259_v16 = vadd.f32 %v2258_v35, %v2147_v27 }
 0xaa9   : > { %v2741_v46 = vpop.f32.mrf.mxu0 }
 0xaaa   : > { %2271 = vst [vmem:[%s4694_s28 + $0x48] sm:$0xff] %v2259_v16 }
 0xaab   : > { %3285 = shalt.err (!%p3282_p3)
}
 0xaac   : > { %s3286_s25 = scalar_lea.hbm %s4712_s21, 1280  ;;  %s3290_s30 = scalar_lea.hbm %s4767_s10, 2560 }
 0xaad   : > { %p3287_p2 = scmp.ne.s32.totalorder %s4712_s21, %s3286_s25  ;;  %p3291_p7 = scmp.lt.s32.totalorder %s4712_s21, %s4767_s10 }
 0xaae   : > { %p3292_p6 = scmp.lt.s32.totalorder %s3290_s30, %s3286_s25 }
 0xaaf   : > { %p3288_p4 = pnand %p3287_p2, %p3452_p5 }
 0xab0   : > { %p3293_p9 = por %p3292_p6, %p3291_p7 }
 0xab1   : > { %p3289_p13 = pneg %p3288_p4 }
 0xab3   : > { %p3294_p10 = pnand %p3293_p9, %p3289_p13 }
 0xab5   : > { %3297 = shalt.err (!%p3294_p10)
}
 0xab6   : > { %s3357_s26 = smov 128   ;;  %s3358_s11 = smov 8  }
 0xab7   : > { %2754 = dma.vmem_to_hbm [thread:$0]  (%p3452_p5), %s4707_s20, 1280, %s4712_s21, %s4717_s17, %s3357_s26, %s3357_s26, %s3358_s11  }
 0xab8 PF: > { %p2771_p12 = scmp.ge.s32.totalorder %s3340_s16, 2  ;;  %s2301_s27 = sand.u32 1, %s3328_s13  }
 0xab9   : > { %p4802_p8 = scmp.ne.s32.totalorder %s4778_s24, 0  ;;  %s2302_s25 = scalar_lea.sflag [#allocation4], %s2301_s27 }
 0xabb   : > { %p2764_p11 = pnand %p2771_p12, %p4802_p8 }
 0xabd   : > { %p2765_p0 = pneg %p2764_p11 }
 0xabf   : > { %3323 = dma.done.wait (%p2765_p0), %s2302_s25, 1280  }
 0xac0   : > { %3325 = vsyncadd (%p2765_p0), %s2302_s25, 4294966016  ;;  %p22_p1 = scmp.ge.s32.totalorder %s3439_s19, 4   ;;  %s4803_s13 = smov %s3332_s14 }
 0xac1   : > { %s4804_s14 = smov %s3336_s15  ;;  %s4805_s15 = smov %s3450_s22 }
 0xac2   : > { %s4806_s16 = smov %s3439_s19  ;;  %24 = sbr.rel (!%p22_p1) target bundleno = 5 (0x5), region = 104 }
 0xac7   :  { %2307 = vsyncpa [#allocation3], 1 }
 0xac8   :  { %2309 = vsyncpa [#allocation3 + $0x1], 1 }
 0xac9   :  { %2310 = vsyncpa [#allocation6], 1 }
 0xaca   :  { %2311 = vsyncpa [#allocation4], 1 }
 0xacb   :  { %2313 = vsyncpa [#allocation4 + $0x1], 1 }

</bundles_post_ra>
